<compile_context>
chip_gen: v7x
topology: tpu7x:2x2x1
jax: 0.10.0
libtpu: 0.0.40
codegen_flags: <defaults>
</compile_context>

<pallas_src>
import math
from functools import partial

import jax
import jax.numpy as jnp
from jax import lax
from jax.experimental import pallas as pl
from jax.experimental.pallas import tpu as pltpu


def _round_up(x, m):
    return (x + m - 1) // m * m


def _reprogramming_kernel(x_ref, src_ref, val_ref,
                          wq_ref, bq_ref, wk_ref, bk_ref, wv_ref, bv_ref,
                          wo_ref, bo_ref, out_ref, *, n_heads):
    """One grid step processes one row tile (B*L rows folded together).

    x_ref  : (TM, d_model)  bf16 target-embedding row tile
    src_ref: (S, d_llm)     bf16 source embeddings (VMEM-resident across steps)
    val_ref: (S, d_llm)     bf16 value embeddings  (VMEM-resident across steps)
    w*_ref : bf16 weights (in_dim, out_dim); 1/sqrt(E) folded into wq/bq
    b*_ref : (1, out_dim) f32 biases
    out_ref: (TM, d_llm) f32
    """
    # Input projections: bf16 operands on the MXU, f32 accumulate + f32 bias.
    q = jnp.dot(x_ref[...], wq_ref[...], preferred_element_type=jnp.float32) + bq_ref[...]
    k = jnp.dot(src_ref[...], wk_ref[...], preferred_element_type=jnp.float32) + bk_ref[...]
    v = jnp.dot(val_ref[...], wv_ref[...], preferred_element_type=jnp.float32) + bv_ref[...]

    tm, he = q.shape
    e = he // n_heads

    qb = q.astype(jnp.bfloat16)
    kb = k.astype(jnp.bfloat16)
    vb = v.astype(jnp.bfloat16)

    # Per-head disjoint lane masks: masking (VPU) replaces 16-lane slices and
    # the final concat (XLU relayout) while keeping every matmul lane-dense.
    lane = lax.broadcasted_iota(jnp.int32, (1, he), 1)

    rep = jnp.zeros((tm, he), jnp.float32)
    for h in range(n_heads):                      # static unroll, H is small
        mask = ((lane >= h * e) & (lane < (h + 1) * e)).astype(jnp.bfloat16)
        kh = kb * mask                            # (S, H*E), zero outside head h
        vh = vb * mask                            # (S, H*E)
        # scores_h = Q . K_h : contract the full lane dim (masked lanes add 0).
        s = lax.dot_general(qb, kh, (((1,), (1,)), ((), ())),
                            preferred_element_type=jnp.float32)        # (TM, S)
        # LogSoftmax over source tokens (scale already folded into Wq/bq),
        # statistics in f32.
        m = jnp.max(s, axis=-1, keepdims=True)
        z = s - m
        a = z - jnp.log(jnp.sum(jnp.exp(z), axis=-1, keepdims=True))
        # TODO(synk): attention dropout is identity here (eval-mode forward);
        # training mode would need pltpu.prng_seed / prng_random_bits.
        # Head outputs occupy disjoint lane blocks -> plain add == concat.
        rep = rep + jnp.dot(a.astype(jnp.bfloat16), vh,
                            preferred_element_type=jnp.float32)        # (TM, H*E)

    out = jnp.dot(rep.astype(jnp.bfloat16), wo_ref[...],
                  preferred_element_type=jnp.float32) + bo_ref[...]
    out_ref[...] = out.astype(out_ref.dtype)


def reprogramming_forward(target_embedding, source_embedding, value_embedding,
                          params, n_heads):
    B, L, d_model = target_embedding.shape
    S, d_llm = source_embedding.shape
    HE = params["wq"].shape[1]
    E = HE // n_heads
    scale = 1.0 / math.sqrt(E)

    # Parameter prep: fold softmax scale into the query projection and cast
    # weights to bf16 (MXU-native on v6e/v7x, halves weight DMA/VMEM).
    wq = (params["wq"] * scale).astype(jnp.bfloat16)
    bq = (params["bq"] * scale).astype(jnp.float32)
    wk = params["wk"].astype(jnp.bfloat16)
    bk = params["bk"].astype(jnp.float32)
    wv = params["wv"].astype(jnp.bfloat16)
    bv = params["bv"].astype(jnp.float32)
    wo = params["wo"].astype(jnp.bfloat16)
    bo = params["bo"].astype(jnp.float32)

    rows = B * L
    x = target_embedding.reshape(rows, d_model).astype(jnp.bfloat16)
    src = source_embedding.astype(jnp.bfloat16)
    val = value_embedding.astype(jnp.bfloat16)

    # Row tile: biggest reasonable tile, multiple of 16 (bf16 sublane packing).
    # At real Time-LLM shapes re-derive against per-generation VMEM (64 MiB/TC
    # on v7x) — resident weights + src/val + 2x double-buffered x/out tiles.
    TM = min(512, _round_up(rows, 16))
    rows_p = _round_up(rows, TM)
    if rows_p != rows:
        x = jnp.pad(x, ((0, rows_p - rows), (0, 0)))

    grid = (rows_p // TM,)

    out = pl.pallas_call(
        partial(_reprogramming_kernel, n_heads=n_heads),
        out_shape=jax.ShapeDtypeStruct((rows_p, d_llm), jnp.float32),
        grid_spec=pltpu.PrefetchScalarGridSpec(
            num_scalar_prefetch=0,
            grid=grid,
            in_specs=[
                pl.BlockSpec((TM, d_model), lambda i: (i, 0)),   # x row tile
                pl.BlockSpec((S, d_llm), lambda i: (0, 0)),      # src  (resident)
                pl.BlockSpec((S, d_llm), lambda i: (0, 0)),      # val  (resident)
                pl.BlockSpec((d_model, HE), lambda i: (0, 0)),   # wq
                pl.BlockSpec((1, HE), lambda i: (0, 0)),         # bq
                pl.BlockSpec((d_llm, HE), lambda i: (0, 0)),     # wk
                pl.BlockSpec((1, HE), lambda i: (0, 0)),         # bk
                pl.BlockSpec((d_llm, HE), lambda i: (0, 0)),     # wv
                pl.BlockSpec((1, HE), lambda i: (0, 0)),         # bv
                pl.BlockSpec((HE, d_llm), lambda i: (0, 0)),     # wo
                pl.BlockSpec((1, d_llm), lambda i: (0, 0)),      # bo
            ],
            out_specs=pl.BlockSpec((TM, d_llm), lambda i: (i, 0)),
        ),
        compiler_params=pltpu.CompilerParams(
            dimension_semantics=("parallel",),       # shards row tiles on v7x TCs
            vmem_limit_bytes=32 * 1024 * 1024,       # safe on v5e/v6e/v7x; demo << this
        ),
    )(x, src, val, wq, bq, wk, bk, wv, bv, wo, bo)

    return out[:rows].reshape(B, L, d_llm)


def _reference(target, src, val, p, n_heads):
    """Pure-JAX f32 reference mirroring the PyTorch forward (eval mode)."""
    B, L, d_model = target.shape
    S, d_llm = src.shape
    HE = p["wq"].shape[1]
    E = HE // n_heads
    q = (target.reshape(B * L, d_model) @ p["wq"] + p["bq"]).reshape(B, L, n_heads, E)
    k = (src @ p["wk"] + p["bk"]).reshape(S, n_heads, E)
    v = (val @ p["wv"] + p["bv"]).reshape(S, n_heads, E)
    scale = 1.0 / math.sqrt(E)
    scores = jnp.einsum('blhe,she->bhls', q, k)
    a = jax.nn.log_softmax(scale * scores, axis=-1)
    rep = jnp.einsum('bhls,she->blhe', a, v).reshape(B, L, HE)
    return rep @ p["wo"] + p["bo"]


if __name__ == "__main__":
    key = jax.random.PRNGKey(0)
    ks = jax.random.split(key, 12)

    # Small, lane-friendly shapes consistent with the module's forward.
    B, L = 2, 16
    d_model = 64
    n_heads = 8
    d_keys = 16            # H * E = 128
    d_llm = 128
    S = 128
    HE = n_heads * d_keys

    target = jax.random.normal(ks[0], (B, L, d_model), jnp.float32)
    source = jax.random.normal(ks[1], (S, d_llm), jnp.float32)
    value = jax.random.normal(ks[2], (S, d_llm), jnp.float32)

    def linear_params(kw, kb, fan_in, fan_out):
        bound = 1.0 / math.sqrt(fan_in)
        w = jax.random.uniform(kw, (fan_in, fan_out), jnp.float32, -bound, bound)
        b = jax.random.uniform(kb, (1, fan_out), jnp.float32, -bound, bound)
        return w, b

    wq, bq = linear_params(ks[3], ks[4], d_model, HE)
    wk, bk = linear_params(ks[5], ks[6], d_llm, HE)
    wv, bv = linear_params(ks[7], ks[8], d_llm, HE)
    wo, bo = linear_params(ks[9], ks[10], HE, d_llm)
    params = dict(wq=wq, bq=bq, wk=wk, bk=bk, wv=wv, bv=bv, wo=wo, bo=bo)

    out = reprogramming_forward(target, source, value, params, n_heads)
    jax.block_until_ready(out)

    ref = _reference(target, source, value, params, n_heads)
    assert out.shape == (B, L, d_llm)
    assert bool(jnp.all(jnp.isfinite(out)))
    # bf16 MXU operands vs f32 reference: check max error normalized by scale.
    rel_err = float(jnp.max(jnp.abs(out - ref)) / (jnp.max(jnp.abs(ref)) + 1e-6))
    assert rel_err < 3e-2, f"normalized max error too high: {rel_err}"
    print("KERNEL_OK")
</pallas_src>

<mosaic_0001>
module attributes {stable_mosaic.version = 11 : i64} {
  func.func @_reprogramming_kernel(%arg0: i32, %arg1: memref<32x64xbf16, #tpu.memory_space<vmem>>, %arg2: memref<128x128xbf16, #tpu.memory_space<vmem>>, %arg3: memref<128x128xbf16, #tpu.memory_space<vmem>>, %arg4: memref<64x128xbf16, #tpu.memory_space<vmem>>, %arg5: memref<1x128xf32, #tpu.memory_space<vmem>>, %arg6: memref<128x128xbf16, #tpu.memory_space<vmem>>, %arg7: memref<1x128xf32, #tpu.memory_space<vmem>>, %arg8: memref<128x128xbf16, #tpu.memory_space<vmem>>, %arg9: memref<1x128xf32, #tpu.memory_space<vmem>>, %arg10: memref<128x128xbf16, #tpu.memory_space<vmem>>, %arg11: memref<1x128xf32, #tpu.memory_space<vmem>>, %arg12: memref<32x128xf32, #tpu.memory_space<vmem>>) attributes {dimension_semantics = [#tpu.dimension_semantics<parallel>], iteration_bounds = array<i64: 1>, scalar_prefetch = 0 : i64, scratch_operands = 0 : i64, tpu.core_type = #tpu.core_type<tc>, window_params = [{transform_indices = @transform_0, window_bounds = array<i64: 32, 64>}, {pipeline_mode = #tpu.pipeline_mode<synchronous>, transform_indices = @transform_1, window_bounds = array<i64: 128, 128>}, {pipeline_mode = #tpu.pipeline_mode<synchronous>, transform_indices = @transform_2, window_bounds = array<i64: 128, 128>}, {pipeline_mode = #tpu.pipeline_mode<synchronous>, transform_indices = @transform_3, window_bounds = array<i64: 64, 128>}, {pipeline_mode = #tpu.pipeline_mode<synchronous>, transform_indices = @transform_4, window_bounds = array<i64: 1, 128>}, {pipeline_mode = #tpu.pipeline_mode<synchronous>, transform_indices = @transform_5, window_bounds = array<i64: 128, 128>}, {pipeline_mode = #tpu.pipeline_mode<synchronous>, transform_indices = @transform_6, window_bounds = array<i64: 1, 128>}, {pipeline_mode = #tpu.pipeline_mode<synchronous>, transform_indices = @transform_7, window_bounds = array<i64: 128, 128>}, {pipeline_mode = #tpu.pipeline_mode<synchronous>, transform_indices = @transform_8, window_bounds = array<i64: 1, 128>}, {pipeline_mode = #tpu.pipeline_mode<synchronous>, transform_indices = @transform_9, window_bounds = array<i64: 128, 128>}, {pipeline_mode = #tpu.pipeline_mode<synchronous>, transform_indices = @transform_10, window_bounds = array<i64: 1, 128>}, {transform_indices = @transform_11, window_bounds = array<i64: 32, 128>}]} {
    %c0 = arith.constant 0 : index
    %c0_0 = arith.constant 0 : index
    %0 = vector.load %arg1[%c0, %c0_0] : memref<32x64xbf16, #tpu.memory_space<vmem>>, vector<32x64xbf16>
    %c0_1 = arith.constant 0 : index
    %c0_2 = arith.constant 0 : index
    %1 = vector.load %arg4[%c0_1, %c0_2] : memref<64x128xbf16, #tpu.memory_space<vmem>>, vector<64x128xbf16>
    %cst = arith.constant dense<0.000000e+00> : vector<32x128xf32>
    %2 = tpu.matmul %0, %1, %cst {dimension_numbers = #tpu.dot_dimension_numbers<[1], [0], [0], [1], [0, 0, 1, 1], [], []>} : vector<32x64xbf16>, vector<64x128xbf16>, vector<32x128xf32> -> vector<32x128xf32>
    %c0_3 = arith.constant 0 : index
    %c0_4 = arith.constant 0 : index
    %3 = vector.load %arg5[%c0_3, %c0_4] : memref<1x128xf32, #tpu.memory_space<vmem>>, vector<1x128xf32>
    %4 = vector.broadcast %3 : vector<1x128xf32> to vector<32x128xf32>
    %5 = arith.addf %2, %4 : vector<32x128xf32>
    %c0_5 = arith.constant 0 : index
    %c0_6 = arith.constant 0 : index
    %6 = vector.load %arg2[%c0_5, %c0_6] : memref<128x128xbf16, #tpu.memory_space<vmem>>, vector<128x128xbf16>
    %c0_7 = arith.constant 0 : index
    %c0_8 = arith.constant 0 : index
    %7 = vector.load %arg6[%c0_7, %c0_8] : memref<128x128xbf16, #tpu.memory_space<vmem>>, vector<128x128xbf16>
    %cst_9 = arith.constant dense<0.000000e+00> : vector<128x128xf32>
    %8 = tpu.matmul %6, %7, %cst_9 {dimension_numbers = #tpu.dot_dimension_numbers<[1], [0], [0], [1], [0, 0, 1, 1], [], []>} : vector<128x128xbf16>, vector<128x128xbf16>, vector<128x128xf32> -> vector<128x128xf32>
    %c0_10 = arith.constant 0 : index
    %c0_11 = arith.constant 0 : index
    %9 = vector.load %arg7[%c0_10, %c0_11] : memref<1x128xf32, #tpu.memory_space<vmem>>, vector<1x128xf32>
    %10 = vector.broadcast %9 : vector<1x128xf32> to vector<128x128xf32>
    %11 = arith.addf %8, %10 : vector<128x128xf32>
    %c0_12 = arith.constant 0 : index
    %c0_13 = arith.constant 0 : index
    %12 = vector.load %arg3[%c0_12, %c0_13] : memref<128x128xbf16, #tpu.memory_space<vmem>>, vector<128x128xbf16>
    %c0_14 = arith.constant 0 : index
    %c0_15 = arith.constant 0 : index
    %13 = vector.load %arg8[%c0_14, %c0_15] : memref<128x128xbf16, #tpu.memory_space<vmem>>, vector<128x128xbf16>
    %cst_16 = arith.constant dense<0.000000e+00> : vector<128x128xf32>
    %14 = tpu.matmul %12, %13, %cst_16 {dimension_numbers = #tpu.dot_dimension_numbers<[1], [0], [0], [1], [0, 0, 1, 1], [], []>} : vector<128x128xbf16>, vector<128x128xbf16>, vector<128x128xf32> -> vector<128x128xf32>
    %c0_17 = arith.constant 0 : index
    %c0_18 = arith.constant 0 : index
    %15 = vector.load %arg9[%c0_17, %c0_18] : memref<1x128xf32, #tpu.memory_space<vmem>>, vector<1x128xf32>
    %16 = vector.broadcast %15 : vector<1x128xf32> to vector<128x128xf32>
    %17 = arith.addf %14, %16 : vector<128x128xf32>
    %18 = arith.truncf %5 : vector<32x128xf32> to vector<32x128xbf16>
    %19 = arith.truncf %11 : vector<128x128xf32> to vector<128x128xbf16>
    %20 = arith.truncf %17 : vector<128x128xf32> to vector<128x128xbf16>
    %21 = tpu.iota {dimensions = array<i32: 1>} : vector<1x128xi32>
    %cst_19 = arith.constant 0.000000e+00 : f32
    %22 = vector.broadcast %cst_19 : f32 to vector<32x128xf32>
    %c0_i32 = arith.constant 0 : i32
    %23 = vector.broadcast %c0_i32 : i32 to vector<1x128xi32>
    %24 = arith.cmpi sge, %21, %23 : vector<1x128xi32>
    %c16_i32 = arith.constant 16 : i32
    %25 = vector.broadcast %c16_i32 : i32 to vector<1x128xi32>
    %26 = arith.cmpi slt, %21, %25 : vector<1x128xi32>
    %27 = arith.andi %24, %26 : vector<1x128xi1>
    %28 = arith.extui %27 : vector<1x128xi1> to vector<1x128xi32>
    %29 = arith.sitofp %28 : vector<1x128xi32> to vector<1x128xf32>
    %30 = arith.truncf %29 : vector<1x128xf32> to vector<1x128xbf16>
    %31 = vector.broadcast %30 : vector<1x128xbf16> to vector<128x128xbf16>
    %32 = arith.mulf %19, %31 : vector<128x128xbf16>
    %33 = vector.broadcast %30 : vector<1x128xbf16> to vector<128x128xbf16>
    %34 = arith.mulf %20, %33 : vector<128x128xbf16>
    %cst_20 = arith.constant dense<0.000000e+00> : vector<32x128xf32>
    %35 = tpu.matmul %18, %32, %cst_20 {dimension_numbers = #tpu.dot_dimension_numbers<[1], [1], [0], [0], [0, 0, 1, 0], [], []>} : vector<32x128xbf16>, vector<128x128xbf16>, vector<32x128xf32> -> vector<32x128xf32>
    %cst_21 = arith.constant dense<0xFF800000> : vector<32xf32>
    %36 = vector.multi_reduction <maximumf>, %35, %cst_21 [1] : vector<32x128xf32> to vector<32xf32>
    %37 = vector.shape_cast %36 : vector<32xf32> to vector<32x1xf32>
    %38 = vector.broadcast %37 : vector<32x1xf32> to vector<32x128xf32>
    %39 = arith.subf %35, %38 : vector<32x128xf32>
    %40 = math.exp %39 : vector<32x128xf32>
    %cst_22 = arith.constant dense<0.000000e+00> : vector<32xf32>
    %41 = vector.multi_reduction <add>, %40, %cst_22 [1] : vector<32x128xf32> to vector<32xf32>
    %42 = vector.shape_cast %41 : vector<32xf32> to vector<32x1xf32>
    %43 = math.log %42 : vector<32x1xf32>
    %44 = vector.broadcast %43 : vector<32x1xf32> to vector<32x128xf32>
    %45 = arith.subf %39, %44 : vector<32x128xf32>
    %46 = arith.truncf %45 : vector<32x128xf32> to vector<32x128xbf16>
    %cst_23 = arith.constant dense<0.000000e+00> : vector<32x128xf32>
    %47 = tpu.matmul %46, %34, %cst_23 {dimension_numbers = #tpu.dot_dimension_numbers<[1], [0], [0], [1], [0, 0, 1, 1], [], []>} : vector<32x128xbf16>, vector<128x128xbf16>, vector<32x128xf32> -> vector<32x128xf32>
    %48 = arith.addf %22, %47 : vector<32x128xf32>
    %c16_i32_24 = arith.constant 16 : i32
    %49 = vector.broadcast %c16_i32_24 : i32 to vector<1x128xi32>
    %50 = arith.cmpi sge, %21, %49 : vector<1x128xi32>
    %c32_i32 = arith.constant 32 : i32
    %51 = vector.broadcast %c32_i32 : i32 to vector<1x128xi32>
    %52 = arith.cmpi slt, %21, %51 : vector<1x128xi32>
    %53 = arith.andi %50, %52 : vector<1x128xi1>
    %54 = arith.extui %53 : vector<1x128xi1> to vector<1x128xi32>
    %55 = arith.sitofp %54 : vector<1x128xi32> to vector<1x128xf32>
    %56 = arith.truncf %55 : vector<1x128xf32> to vector<1x128xbf16>
    %57 = vector.broadcast %56 : vector<1x128xbf16> to vector<128x128xbf16>
    %58 = arith.mulf %19, %57 : vector<128x128xbf16>
    %59 = vector.broadcast %56 : vector<1x128xbf16> to vector<128x128xbf16>
    %60 = arith.mulf %20, %59 : vector<128x128xbf16>
    %cst_25 = arith.constant dense<0.000000e+00> : vector<32x128xf32>
    %61 = tpu.matmul %18, %58, %cst_25 {dimension_numbers = #tpu.dot_dimension_numbers<[1], [1], [0], [0], [0, 0, 1, 0], [], []>} : vector<32x128xbf16>, vector<128x128xbf16>, vector<32x128xf32> -> vector<32x128xf32>
    %cst_26 = arith.constant dense<0xFF800000> : vector<32xf32>
    %62 = vector.multi_reduction <maximumf>, %61, %cst_26 [1] : vector<32x128xf32> to vector<32xf32>
    %63 = vector.shape_cast %62 : vector<32xf32> to vector<32x1xf32>
    %64 = vector.broadcast %63 : vector<32x1xf32> to vector<32x128xf32>
    %65 = arith.subf %61, %64 : vector<32x128xf32>
    %66 = math.exp %65 : vector<32x128xf32>
    %cst_27 = arith.constant dense<0.000000e+00> : vector<32xf32>
    %67 = vector.multi_reduction <add>, %66, %cst_27 [1] : vector<32x128xf32> to vector<32xf32>
    %68 = vector.shape_cast %67 : vector<32xf32> to vector<32x1xf32>
    %69 = math.log %68 : vector<32x1xf32>
    %70 = vector.broadcast %69 : vector<32x1xf32> to vector<32x128xf32>
    %71 = arith.subf %65, %70 : vector<32x128xf32>
    %72 = arith.truncf %71 : vector<32x128xf32> to vector<32x128xbf16>
    %cst_28 = arith.constant dense<0.000000e+00> : vector<32x128xf32>
    %73 = tpu.matmul %72, %60, %cst_28 {dimension_numbers = #tpu.dot_dimension_numbers<[1], [0], [0], [1], [0, 0, 1, 1], [], []>} : vector<32x128xbf16>, vector<128x128xbf16>, vector<32x128xf32> -> vector<32x128xf32>
    %74 = arith.addf %48, %73 : vector<32x128xf32>
    %c32_i32_29 = arith.constant 32 : i32
    %75 = vector.broadcast %c32_i32_29 : i32 to vector<1x128xi32>
    %76 = arith.cmpi sge, %21, %75 : vector<1x128xi32>
    %c48_i32 = arith.constant 48 : i32
    %77 = vector.broadcast %c48_i32 : i32 to vector<1x128xi32>
    %78 = arith.cmpi slt, %21, %77 : vector<1x128xi32>
    %79 = arith.andi %76, %78 : vector<1x128xi1>
    %80 = arith.extui %79 : vector<1x128xi1> to vector<1x128xi32>
    %81 = arith.sitofp %80 : vector<1x128xi32> to vector<1x128xf32>
    %82 = arith.truncf %81 : vector<1x128xf32> to vector<1x128xbf16>
    %83 = vector.broadcast %82 : vector<1x128xbf16> to vector<128x128xbf16>
    %84 = arith.mulf %19, %83 : vector<128x128xbf16>
    %85 = vector.broadcast %82 : vector<1x128xbf16> to vector<128x128xbf16>
    %86 = arith.mulf %20, %85 : vector<128x128xbf16>
    %cst_30 = arith.constant dense<0.000000e+00> : vector<32x128xf32>
    %87 = tpu.matmul %18, %84, %cst_30 {dimension_numbers = #tpu.dot_dimension_numbers<[1], [1], [0], [0], [0, 0, 1, 0], [], []>} : vector<32x128xbf16>, vector<128x128xbf16>, vector<32x128xf32> -> vector<32x128xf32>
    %cst_31 = arith.constant dense<0xFF800000> : vector<32xf32>
    %88 = vector.multi_reduction <maximumf>, %87, %cst_31 [1] : vector<32x128xf32> to vector<32xf32>
    %89 = vector.shape_cast %88 : vector<32xf32> to vector<32x1xf32>
    %90 = vector.broadcast %89 : vector<32x1xf32> to vector<32x128xf32>
    %91 = arith.subf %87, %90 : vector<32x128xf32>
    %92 = math.exp %91 : vector<32x128xf32>
    %cst_32 = arith.constant dense<0.000000e+00> : vector<32xf32>
    %93 = vector.multi_reduction <add>, %92, %cst_32 [1] : vector<32x128xf32> to vector<32xf32>
    %94 = vector.shape_cast %93 : vector<32xf32> to vector<32x1xf32>
    %95 = math.log %94 : vector<32x1xf32>
    %96 = vector.broadcast %95 : vector<32x1xf32> to vector<32x128xf32>
    %97 = arith.subf %91, %96 : vector<32x128xf32>
    %98 = arith.truncf %97 : vector<32x128xf32> to vector<32x128xbf16>
    %cst_33 = arith.constant dense<0.000000e+00> : vector<32x128xf32>
    %99 = tpu.matmul %98, %86, %cst_33 {dimension_numbers = #tpu.dot_dimension_numbers<[1], [0], [0], [1], [0, 0, 1, 1], [], []>} : vector<32x128xbf16>, vector<128x128xbf16>, vector<32x128xf32> -> vector<32x128xf32>
    %100 = arith.addf %74, %99 : vector<32x128xf32>
    %c48_i32_34 = arith.constant 48 : i32
    %101 = vector.broadcast %c48_i32_34 : i32 to vector<1x128xi32>
    %102 = arith.cmpi sge, %21, %101 : vector<1x128xi32>
    %c64_i32 = arith.constant 64 : i32
    %103 = vector.broadcast %c64_i32 : i32 to vector<1x128xi32>
    %104 = arith.cmpi slt, %21, %103 : vector<1x128xi32>
    %105 = arith.andi %102, %104 : vector<1x128xi1>
    %106 = arith.extui %105 : vector<1x128xi1> to vector<1x128xi32>
    %107 = arith.sitofp %106 : vector<1x128xi32> to vector<1x128xf32>
    %108 = arith.truncf %107 : vector<1x128xf32> to vector<1x128xbf16>
    %109 = vector.broadcast %108 : vector<1x128xbf16> to vector<128x128xbf16>
    %110 = arith.mulf %19, %109 : vector<128x128xbf16>
    %111 = vector.broadcast %108 : vector<1x128xbf16> to vector<128x128xbf16>
    %112 = arith.mulf %20, %111 : vector<128x128xbf16>
    %cst_35 = arith.constant dense<0.000000e+00> : vector<32x128xf32>
    %113 = tpu.matmul %18, %110, %cst_35 {dimension_numbers = #tpu.dot_dimension_numbers<[1], [1], [0], [0], [0, 0, 1, 0], [], []>} : vector<32x128xbf16>, vector<128x128xbf16>, vector<32x128xf32> -> vector<32x128xf32>
    %cst_36 = arith.constant dense<0xFF800000> : vector<32xf32>
    %114 = vector.multi_reduction <maximumf>, %113, %cst_36 [1] : vector<32x128xf32> to vector<32xf32>
    %115 = vector.shape_cast %114 : vector<32xf32> to vector<32x1xf32>
    %116 = vector.broadcast %115 : vector<32x1xf32> to vector<32x128xf32>
    %117 = arith.subf %113, %116 : vector<32x128xf32>
    %118 = math.exp %117 : vector<32x128xf32>
    %cst_37 = arith.constant dense<0.000000e+00> : vector<32xf32>
    %119 = vector.multi_reduction <add>, %118, %cst_37 [1] : vector<32x128xf32> to vector<32xf32>
    %120 = vector.shape_cast %119 : vector<32xf32> to vector<32x1xf32>
    %121 = math.log %120 : vector<32x1xf32>
    %122 = vector.broadcast %121 : vector<32x1xf32> to vector<32x128xf32>
    %123 = arith.subf %117, %122 : vector<32x128xf32>
    %124 = arith.truncf %123 : vector<32x128xf32> to vector<32x128xbf16>
    %cst_38 = arith.constant dense<0.000000e+00> : vector<32x128xf32>
    %125 = tpu.matmul %124, %112, %cst_38 {dimension_numbers = #tpu.dot_dimension_numbers<[1], [0], [0], [1], [0, 0, 1, 1], [], []>} : vector<32x128xbf16>, vector<128x128xbf16>, vector<32x128xf32> -> vector<32x128xf32>
    %126 = arith.addf %100, %125 : vector<32x128xf32>
    %c64_i32_39 = arith.constant 64 : i32
    %127 = vector.broadcast %c64_i32_39 : i32 to vector<1x128xi32>
    %128 = arith.cmpi sge, %21, %127 : vector<1x128xi32>
    %c80_i32 = arith.constant 80 : i32
    %129 = vector.broadcast %c80_i32 : i32 to vector<1x128xi32>
    %130 = arith.cmpi slt, %21, %129 : vector<1x128xi32>
    %131 = arith.andi %128, %130 : vector<1x128xi1>
    %132 = arith.extui %131 : vector<1x128xi1> to vector<1x128xi32>
    %133 = arith.sitofp %132 : vector<1x128xi32> to vector<1x128xf32>
    %134 = arith.truncf %133 : vector<1x128xf32> to vector<1x128xbf16>
    %135 = vector.broadcast %134 : vector<1x128xbf16> to vector<128x128xbf16>
    %136 = arith.mulf %19, %135 : vector<128x128xbf16>
    %137 = vector.broadcast %134 : vector<1x128xbf16> to vector<128x128xbf16>
    %138 = arith.mulf %20, %137 : vector<128x128xbf16>
    %cst_40 = arith.constant dense<0.000000e+00> : vector<32x128xf32>
    %139 = tpu.matmul %18, %136, %cst_40 {dimension_numbers = #tpu.dot_dimension_numbers<[1], [1], [0], [0], [0, 0, 1, 0], [], []>} : vector<32x128xbf16>, vector<128x128xbf16>, vector<32x128xf32> -> vector<32x128xf32>
    %cst_41 = arith.constant dense<0xFF800000> : vector<32xf32>
    %140 = vector.multi_reduction <maximumf>, %139, %cst_41 [1] : vector<32x128xf32> to vector<32xf32>
    %141 = vector.shape_cast %140 : vector<32xf32> to vector<32x1xf32>
    %142 = vector.broadcast %141 : vector<32x1xf32> to vector<32x128xf32>
    %143 = arith.subf %139, %142 : vector<32x128xf32>
    %144 = math.exp %143 : vector<32x128xf32>
    %cst_42 = arith.constant dense<0.000000e+00> : vector<32xf32>
    %145 = vector.multi_reduction <add>, %144, %cst_42 [1] : vector<32x128xf32> to vector<32xf32>
    %146 = vector.shape_cast %145 : vector<32xf32> to vector<32x1xf32>
    %147 = math.log %146 : vector<32x1xf32>
    %148 = vector.broadcast %147 : vector<32x1xf32> to vector<32x128xf32>
    %149 = arith.subf %143, %148 : vector<32x128xf32>
    %150 = arith.truncf %149 : vector<32x128xf32> to vector<32x128xbf16>
    %cst_43 = arith.constant dense<0.000000e+00> : vector<32x128xf32>
    %151 = tpu.matmul %150, %138, %cst_43 {dimension_numbers = #tpu.dot_dimension_numbers<[1], [0], [0], [1], [0, 0, 1, 1], [], []>} : vector<32x128xbf16>, vector<128x128xbf16>, vector<32x128xf32> -> vector<32x128xf32>
    %152 = arith.addf %126, %151 : vector<32x128xf32>
    %c80_i32_44 = arith.constant 80 : i32
    %153 = vector.broadcast %c80_i32_44 : i32 to vector<1x128xi32>
    %154 = arith.cmpi sge, %21, %153 : vector<1x128xi32>
    %c96_i32 = arith.constant 96 : i32
    %155 = vector.broadcast %c96_i32 : i32 to vector<1x128xi32>
    %156 = arith.cmpi slt, %21, %155 : vector<1x128xi32>
    %157 = arith.andi %154, %156 : vector<1x128xi1>
    %158 = arith.extui %157 : vector<1x128xi1> to vector<1x128xi32>
    %159 = arith.sitofp %158 : vector<1x128xi32> to vector<1x128xf32>
    %160 = arith.truncf %159 : vector<1x128xf32> to vector<1x128xbf16>
    %161 = vector.broadcast %160 : vector<1x128xbf16> to vector<128x128xbf16>
    %162 = arith.mulf %19, %161 : vector<128x128xbf16>
    %163 = vector.broadcast %160 : vector<1x128xbf16> to vector<128x128xbf16>
    %164 = arith.mulf %20, %163 : vector<128x128xbf16>
    %cst_45 = arith.constant dense<0.000000e+00> : vector<32x128xf32>
    %165 = tpu.matmul %18, %162, %cst_45 {dimension_numbers = #tpu.dot_dimension_numbers<[1], [1], [0], [0], [0, 0, 1, 0], [], []>} : vector<32x128xbf16>, vector<128x128xbf16>, vector<32x128xf32> -> vector<32x128xf32>
    %cst_46 = arith.constant dense<0xFF800000> : vector<32xf32>
    %166 = vector.multi_reduction <maximumf>, %165, %cst_46 [1] : vector<32x128xf32> to vector<32xf32>
    %167 = vector.shape_cast %166 : vector<32xf32> to vector<32x1xf32>
    %168 = vector.broadcast %167 : vector<32x1xf32> to vector<32x128xf32>
    %169 = arith.subf %165, %168 : vector<32x128xf32>
    %170 = math.exp %169 : vector<32x128xf32>
    %cst_47 = arith.constant dense<0.000000e+00> : vector<32xf32>
    %171 = vector.multi_reduction <add>, %170, %cst_47 [1] : vector<32x128xf32> to vector<32xf32>
    %172 = vector.shape_cast %171 : vector<32xf32> to vector<32x1xf32>
    %173 = math.log %172 : vector<32x1xf32>
    %174 = vector.broadcast %173 : vector<32x1xf32> to vector<32x128xf32>
    %175 = arith.subf %169, %174 : vector<32x128xf32>
    %176 = arith.truncf %175 : vector<32x128xf32> to vector<32x128xbf16>
    %cst_48 = arith.constant dense<0.000000e+00> : vector<32x128xf32>
    %177 = tpu.matmul %176, %164, %cst_48 {dimension_numbers = #tpu.dot_dimension_numbers<[1], [0], [0], [1], [0, 0, 1, 1], [], []>} : vector<32x128xbf16>, vector<128x128xbf16>, vector<32x128xf32> -> vector<32x128xf32>
    %178 = arith.addf %152, %177 : vector<32x128xf32>
    %c96_i32_49 = arith.constant 96 : i32
    %179 = vector.broadcast %c96_i32_49 : i32 to vector<1x128xi32>
    %180 = arith.cmpi sge, %21, %179 : vector<1x128xi32>
    %c112_i32 = arith.constant 112 : i32
    %181 = vector.broadcast %c112_i32 : i32 to vector<1x128xi32>
    %182 = arith.cmpi slt, %21, %181 : vector<1x128xi32>
    %183 = arith.andi %180, %182 : vector<1x128xi1>
    %184 = arith.extui %183 : vector<1x128xi1> to vector<1x128xi32>
    %185 = arith.sitofp %184 : vector<1x128xi32> to vector<1x128xf32>
    %186 = arith.truncf %185 : vector<1x128xf32> to vector<1x128xbf16>
    %187 = vector.broadcast %186 : vector<1x128xbf16> to vector<128x128xbf16>
    %188 = arith.mulf %19, %187 : vector<128x128xbf16>
    %189 = vector.broadcast %186 : vector<1x128xbf16> to vector<128x128xbf16>
    %190 = arith.mulf %20, %189 : vector<128x128xbf16>
    %cst_50 = arith.constant dense<0.000000e+00> : vector<32x128xf32>
    %191 = tpu.matmul %18, %188, %cst_50 {dimension_numbers = #tpu.dot_dimension_numbers<[1], [1], [0], [0], [0, 0, 1, 0], [], []>} : vector<32x128xbf16>, vector<128x128xbf16>, vector<32x128xf32> -> vector<32x128xf32>
    %cst_51 = arith.constant dense<0xFF800000> : vector<32xf32>
    %192 = vector.multi_reduction <maximumf>, %191, %cst_51 [1] : vector<32x128xf32> to vector<32xf32>
    %193 = vector.shape_cast %192 : vector<32xf32> to vector<32x1xf32>
    %194 = vector.broadcast %193 : vector<32x1xf32> to vector<32x128xf32>
    %195 = arith.subf %191, %194 : vector<32x128xf32>
    %196 = math.exp %195 : vector<32x128xf32>
    %cst_52 = arith.constant dense<0.000000e+00> : vector<32xf32>
    %197 = vector.multi_reduction <add>, %196, %cst_52 [1] : vector<32x128xf32> to vector<32xf32>
    %198 = vector.shape_cast %197 : vector<32xf32> to vector<32x1xf32>
    %199 = math.log %198 : vector<32x1xf32>
    %200 = vector.broadcast %199 : vector<32x1xf32> to vector<32x128xf32>
    %201 = arith.subf %195, %200 : vector<32x128xf32>
    %202 = arith.truncf %201 : vector<32x128xf32> to vector<32x128xbf16>
    %cst_53 = arith.constant dense<0.000000e+00> : vector<32x128xf32>
    %203 = tpu.matmul %202, %190, %cst_53 {dimension_numbers = #tpu.dot_dimension_numbers<[1], [0], [0], [1], [0, 0, 1, 1], [], []>} : vector<32x128xbf16>, vector<128x128xbf16>, vector<32x128xf32> -> vector<32x128xf32>
    %204 = arith.addf %178, %203 : vector<32x128xf32>
    %c112_i32_54 = arith.constant 112 : i32
    %205 = vector.broadcast %c112_i32_54 : i32 to vector<1x128xi32>
    %206 = arith.cmpi sge, %21, %205 : vector<1x128xi32>
    %c128_i32 = arith.constant 128 : i32
    %207 = vector.broadcast %c128_i32 : i32 to vector<1x128xi32>
    %208 = arith.cmpi slt, %21, %207 : vector<1x128xi32>
    %209 = arith.andi %206, %208 : vector<1x128xi1>
    %210 = arith.extui %209 : vector<1x128xi1> to vector<1x128xi32>
    %211 = arith.sitofp %210 : vector<1x128xi32> to vector<1x128xf32>
    %212 = arith.truncf %211 : vector<1x128xf32> to vector<1x128xbf16>
    %213 = vector.broadcast %212 : vector<1x128xbf16> to vector<128x128xbf16>
    %214 = arith.mulf %19, %213 : vector<128x128xbf16>
    %215 = vector.broadcast %212 : vector<1x128xbf16> to vector<128x128xbf16>
    %216 = arith.mulf %20, %215 : vector<128x128xbf16>
    %cst_55 = arith.constant dense<0.000000e+00> : vector<32x128xf32>
    %217 = tpu.matmul %18, %214, %cst_55 {dimension_numbers = #tpu.dot_dimension_numbers<[1], [1], [0], [0], [0, 0, 1, 0], [], []>} : vector<32x128xbf16>, vector<128x128xbf16>, vector<32x128xf32> -> vector<32x128xf32>
    %cst_56 = arith.constant dense<0xFF800000> : vector<32xf32>
    %218 = vector.multi_reduction <maximumf>, %217, %cst_56 [1] : vector<32x128xf32> to vector<32xf32>
    %219 = vector.shape_cast %218 : vector<32xf32> to vector<32x1xf32>
    %220 = vector.broadcast %219 : vector<32x1xf32> to vector<32x128xf32>
    %221 = arith.subf %217, %220 : vector<32x128xf32>
    %222 = math.exp %221 : vector<32x128xf32>
    %cst_57 = arith.constant dense<0.000000e+00> : vector<32xf32>
    %223 = vector.multi_reduction <add>, %222, %cst_57 [1] : vector<32x128xf32> to vector<32xf32>
    %224 = vector.shape_cast %223 : vector<32xf32> to vector<32x1xf32>
    %225 = math.log %224 : vector<32x1xf32>
    %226 = vector.broadcast %225 : vector<32x1xf32> to vector<32x128xf32>
    %227 = arith.subf %221, %226 : vector<32x128xf32>
    %228 = arith.truncf %227 : vector<32x128xf32> to vector<32x128xbf16>
    %cst_58 = arith.constant dense<0.000000e+00> : vector<32x128xf32>
    %229 = tpu.matmul %228, %216, %cst_58 {dimension_numbers = #tpu.dot_dimension_numbers<[1], [0], [0], [1], [0, 0, 1, 1], [], []>} : vector<32x128xbf16>, vector<128x128xbf16>, vector<32x128xf32> -> vector<32x128xf32>
    %230 = arith.addf %204, %229 : vector<32x128xf32>
    %231 = arith.truncf %230 : vector<32x128xf32> to vector<32x128xbf16>
    %c0_59 = arith.constant 0 : index
    %c0_60 = arith.constant 0 : index
    %232 = vector.load %arg10[%c0_59, %c0_60] : memref<128x128xbf16, #tpu.memory_space<vmem>>, vector<128x128xbf16>
    %cst_61 = arith.constant dense<0.000000e+00> : vector<32x128xf32>
    %233 = tpu.matmul %231, %232, %cst_61 {dimension_numbers = #tpu.dot_dimension_numbers<[1], [0], [0], [1], [0, 0, 1, 1], [], []>} : vector<32x128xbf16>, vector<128x128xbf16>, vector<32x128xf32> -> vector<32x128xf32>
    %c0_62 = arith.constant 0 : index
    %c0_63 = arith.constant 0 : index
    %234 = vector.load %arg11[%c0_62, %c0_63] : memref<1x128xf32, #tpu.memory_space<vmem>>, vector<1x128xf32>
    %235 = vector.broadcast %234 : vector<1x128xf32> to vector<32x128xf32>
    %236 = arith.addf %233, %235 : vector<32x128xf32>
    %c0_64 = arith.constant 0 : index
    %c0_65 = arith.constant 0 : index
    %237 = vector.load %arg12[%c0_64, %c0_65] : memref<32x128xf32, #tpu.memory_space<vmem>>, vector<32x128xf32>
    tpu.vector_store %arg12[%c0_64, %c0_65], %236 {strides = array<i32>} : memref<32x128xf32, #tpu.memory_space<vmem>>, vector<32x128xf32>,
    return
  }
  func.func @transform_0(%arg0: i32) -> (i32, i32) {
    %c0_i32 = arith.constant 0 : i32
    %c0_i32_0 = arith.constant 0 : i32
    return %arg0, %c0_i32 : i32, i32
  }
  func.func @transform_1(%arg0: i32) -> (i32, i32) {
    %c0_i32 = arith.constant 0 : i32
    %c0_i32_0 = arith.constant 0 : i32
    %c0_i32_1 = arith.constant 0 : i32
    return %c0_i32, %c0_i32_0 : i32, i32
  }
  func.func @transform_2(%arg0: i32) -> (i32, i32) {
    %c0_i32 = arith.constant 0 : i32
    %c0_i32_0 = arith.constant 0 : i32
    %c0_i32_1 = arith.constant 0 : i32
    return %c0_i32, %c0_i32_0 : i32, i32
  }
  func.func @transform_3(%arg0: i32) -> (i32, i32) {
    %c0_i32 = arith.constant 0 : i32
    %c0_i32_0 = arith.constant 0 : i32
    %c0_i32_1 = arith.constant 0 : i32
    return %c0_i32, %c0_i32_0 : i32, i32
  }
  func.func @transform_4(%arg0: i32) -> (i32, i32) {
    %c0_i32 = arith.constant 0 : i32
    %c0_i32_0 = arith.constant 0 : i32
    %c0_i32_1 = arith.constant 0 : i32
    return %c0_i32, %c0_i32_0 : i32, i32
  }
  func.func @transform_5(%arg0: i32) -> (i32, i32) {
    %c0_i32 = arith.constant 0 : i32
    %c0_i32_0 = arith.constant 0 : i32
    %c0_i32_1 = arith.constant 0 : i32
    return %c0_i32, %c0_i32_0 : i32, i32
  }
  func.func @transform_6(%arg0: i32) -> (i32, i32) {
    %c0_i32 = arith.constant 0 : i32
    %c0_i32_0 = arith.constant 0 : i32
    %c0_i32_1 = arith.constant 0 : i32
    return %c0_i32, %c0_i32_0 : i32, i32
  }
  func.func @transform_7(%arg0: i32) -> (i32, i32) {
    %c0_i32 = arith.constant 0 : i32
    %c0_i32_0 = arith.constant 0 : i32
    %c0_i32_1 = arith.constant 0 : i32
    return %c0_i32, %c0_i32_0 : i32, i32
  }
  func.func @transform_8(%arg0: i32) -> (i32, i32) {
    %c0_i32 = arith.constant 0 : i32
    %c0_i32_0 = arith.constant 0 : i32
    %c0_i32_1 = arith.constant 0 : i32
    return %c0_i32, %c0_i32_0 : i32, i32
  }
  func.func @transform_9(%arg0: i32) -> (i32, i32) {
    %c0_i32 = arith.constant 0 : i32
    %c0_i32_0 = arith.constant 0 : i32
    %c0_i32_1 = arith.constant 0 : i32
    return %c0_i32, %c0_i32_0 : i32, i32
  }
  func.func @transform_10(%arg0: i32) -> (i32, i32) {
    %c0_i32 = arith.constant 0 : i32
    %c0_i32_0 = arith.constant 0 : i32
    %c0_i32_1 = arith.constant 0 : i32
    return %c0_i32, %c0_i32_0 : i32, i32
  }
  func.func @transform_11(%arg0: i32) -> (i32, i32) {
    %c0_i32 = arith.constant 0 : i32
    %c0_i32_0 = arith.constant 0 : i32
    return %arg0, %c0_i32 : i32, i32
  }
}

</mosaic_0001>

<bundles_post_ra>
// kernel: tpu_custom_call.1
= control target key start
LH: loop header
LB: loop body
LE: loop exit
PB: predicated region body
PF: predicated region fallthrough
CT: control target
= control target key end

     0   :  { %16 = vsyncpa [#allocation3], 0  ;;  %s4156_s0 = inlined_call_operand.hbm [shape: bf16[32,64], index: 0, kind: input, shape index: {}]   ;;  %s4157_s1 = inlined_call_operand.hbm [shape: bf16[128,128], index: 1, kind: input, shape index: {}]   ;;  %s4158_s2 = inlined_call_operand.hbm [shape: bf16[128,128], index: 2, kind: input, shape index: {}]   ;;  %s4159_s3 = inlined_call_operand.hbm [shape: bf16[64,128], index: 3, kind: input, shape index: {}]   ;;  %s4160_s4 = inlined_call_operand.vmem [shape: f32[1,128], index: 4, kind: input, shape index: {}]   ;;  %s4161_s5 = inlined_call_operand.hbm [shape: bf16[128,128], index: 5, kind: input, shape index: {}]   ;;  %s4162_s6 = inlined_call_operand.vmem [shape: f32[1,128], index: 6, kind: input, shape index: {}]   ;;  %s4163_s7 = inlined_call_operand.hbm [shape: bf16[128,128], index: 7, kind: input, shape index: {}]   ;;  %s4164_s8 = inlined_call_operand.vmem [shape: f32[1,128], index: 8, kind: input, shape index: {}]   ;;  %s4165_s9 = inlined_call_operand.hbm [shape: bf16[128,128], index: 9, kind: input, shape index: {}]   ;;  %s4166_s10 = inlined_call_operand.vmem [shape: f32[1,128], index: 10, kind: input, shape index: {}]   ;;  %s4167_s11 = inlined_call_operand.hbm [shape: f32[32,128], index: 11, kind: output, shape index: {}]  }
   0x1   :  { %17 = vsyncpa [#allocation6], 0 }
   0x2   :  { %18 = vsyncpa [#allocation9], 0 }
   0x3   :  { %19 = vsyncpa [#allocation12], 0 }
   0x4   :  { %20 = vsyncpa [#allocation4], 0  ;;  %s3279_s17 = smov [#allocation5]   ;;  %s3280_s19 = smov [#allocation8]  }
   0x5   :  { %s38_s18 = sshll.u32 %s3279_s17, 4  ;;  %s62_s20 = sshll.u32 %s3280_s19, 4  ;;  %s39_s18 = int_to_ptr.vmem [resolvable:$true] %s38_s18  ;;  %s3352_s20 = int_to_ptr.vmem [resolvable:$true] %s62_s20 }
   0x6   :  { %s3093_s23 = scalar_lea.hbm %s4157_s1, 1024 }
   0x7   :  { %p3094_p0 = scmp.ne.s32.totalorder %s4157_s1, %s3093_s23  ;;  %p3097_p1 = scmp.lt.u32.totalorder %s3093_s23, %s4157_s1 }
   0x9   :  { %p3099_p2 = pnand %p3097_p1, %p3094_p0 }
   0xb   :  { %3102 = shalt.err (!%p3099_p2)
}
   0xc   :  { %s3103_s28 = scalar_lea.vmem %s39_s18, 1024  ;;  %p3108_p4 = scmp.lt.s32.totalorder %s39_s18, %s39_s18 }
   0xd   :  { %p3104_p3 = scmp.ne.s32.totalorder %s39_s18, %s3103_s28  ;;  %p3109_p5 = scmp.lt.s32.totalorder %s3103_s28, %s3103_s28 }
   0xf   :  { %p3110_p6 = por %p3109_p5, %p3108_p4 }
  0x11   :  { %p3111_p7 = pnand %p3110_p6, %p3104_p3 }
  0x13   :  { %3114 = shalt.err (!%p3111_p7)
}
  0x14   :  { %s3281_s29 = smov 64   ;;  %s3282_s30 = smov 4  }
  0x15   :  { %44 = dma.hbm_to_vmem [thread:$0]  %s4157_s1, 1024, %s39_s18, [#allocation6], %s3281_s29, %s3281_s29, %s3282_s30  }
  0x16   :  { %s3115_s16 = scalar_lea.hbm %s4159_s3, 512 }
  0x17   :  { %p3116_p8 = scmp.ne.s32.totalorder %s4159_s3, %s3115_s16  ;;  %p3119_p9 = scmp.lt.u32.totalorder %s3115_s16, %s4159_s3 }
  0x19   :  { %p3121_p10 = pnand %p3119_p9, %p3116_p8 }
  0x1b   :  { %3124 = shalt.err (!%p3121_p10)
}
  0x1c   :  { %s3125_s23 = scalar_lea.vmem %s3352_s20, 512  ;;  %p3130_p12 = scmp.lt.s32.totalorder %s3352_s20, %s3352_s20 }
  0x1d   :  { %p3126_p11 = scmp.ne.s32.totalorder %s3352_s20, %s3125_s23  ;;  %p3131_p13 = scmp.lt.s32.totalorder %s3125_s23, %s3125_s23 }
  0x1f   :  { %p3132_p0 = por %p3131_p13, %p3130_p12 }
  0x21   :  { %p3133_p1 = pnand %p3132_p0, %p3126_p11 }
  0x23   :  { %3136 = shalt.err (!%p3133_p1)
}
  0x24   :  { %68 = dma.hbm_to_vmem [thread:$0]  %s4159_s3, 512, %s3352_s20, [#allocation9], %s3281_s29, %s3281_s29, %s3282_s30  }
  0x25   :  { %s3283_s24 = smov [#allocation11]   ;;  %s3284_s26 = smov [#allocation2]  }
  0x26   :  { %s90_s25 = sshll.u32 %s3283_s24, 4  ;;  %s26_s27 = sshll.u32 %s3284_s26, 4  ;;  %s91_s25 = int_to_ptr.vmem [resolvable:$true] %s90_s25  ;;  %s3389_s27 = int_to_ptr.vmem [resolvable:$true] %s26_s27 }
  0x27   :  { %s3137_s13 = scalar_lea.hbm %s4163_s7, 1024 }
  0x28   :  { %p3138_p2 = scmp.ne.s32.totalorder %s4163_s7, %s3137_s13  ;;  %p3141_p3 = scmp.lt.u32.totalorder %s3137_s13, %s4163_s7 }
  0x2a   :  { %p3143_p4 = pnand %p3141_p3, %p3138_p2 }
  0x2c   :  { %3146 = shalt.err (!%p3143_p4)
}
  0x2d   :  { %s3147_s3 = scalar_lea.vmem %s91_s25, 1024  ;;  %p3152_p6 = scmp.lt.s32.totalorder %s91_s25, %s91_s25 }
  0x2e   :  { %p3148_p5 = scmp.ne.s32.totalorder %s91_s25, %s3147_s3  ;;  %p3153_p7 = scmp.lt.s32.totalorder %s3147_s3, %s3147_s3 }
  0x30   :  { %p3154_p8 = por %p3153_p7, %p3152_p6 }
  0x32   :  { %p3155_p9 = pnand %p3154_p8, %p3148_p5 }
  0x34   :  { %3158 = shalt.err (!%p3155_p9)
}
  0x35   :  { %96 = dma.hbm_to_vmem [thread:$0]  %s4163_s7, 1024, %s91_s25, [#allocation12], %s3281_s29, %s3281_s29, %s3282_s30  }
  0x36   :  { %s3159_s23 = scalar_lea.hbm %s4156_s0, 256 }
  0x37   :  { %p3160_p10 = scmp.ne.s32.totalorder %s4156_s0, %s3159_s23  ;;  %p3163_p11 = scmp.lt.u32.totalorder %s3159_s23, %s4156_s0 }
  0x39   :  { %p3165_p12 = pnand %p3163_p11, %p3160_p10 }
  0x3b   :  { %3168 = shalt.err (!%p3165_p12)
}
  0x3c   :  { %s3169_s28 = scalar_lea.vmem %s3389_s27, 256  ;;  %p3174_p0 = scmp.lt.s32.totalorder %s3389_s27, %s3389_s27 }
  0x3d   :  { %p3170_p13 = scmp.ne.s32.totalorder %s3389_s27, %s3169_s28  ;;  %p3175_p1 = scmp.lt.s32.totalorder %s3169_s28, %s3169_s28 }
  0x3f   :  { %p3176_p2 = por %p3175_p1, %p3174_p0 }
  0x41   :  { %p3177_p3 = pnand %p3176_p2, %p3170_p13 }
  0x43   :  { %3180 = shalt.err (!%p3177_p3)
}
  0x44   :  { %32 = dma.hbm_to_vmem [thread:$0]  %s4156_s0, 256, %s3389_s27, [#allocation3], %s3281_s29, %s3281_s29, %s3282_s30  }
  0x45   :  { %s3285_s12 = smov [#allocation7]   ;;  %s3286_s14 = smov [#allocation10]  }
  0x46   :  { %s50_s13 = sshll.u32 %s3285_s12, 4  ;;  %s76_s15 = sshll.u32 %s3286_s14, 4  ;;  %s51_s13 = int_to_ptr.vmem [resolvable:$true] %s50_s13  ;;  %s3426_s15 = int_to_ptr.vmem [resolvable:$true] %s76_s15 }
  0x47   :  { %s3181_s3 = scalar_lea.hbm %s4158_s2, 1024 }
  0x48   :  { %p3182_p4 = scmp.ne.s32.totalorder %s4158_s2, %s3181_s3  ;;  %p3185_p5 = scmp.lt.u32.totalorder %s3181_s3, %s4158_s2 }
  0x4a   :  { %p3187_p6 = pnand %p3185_p5, %p3182_p4 }
  0x4c   :  { %3190 = shalt.err (!%p3187_p6)
}
  0x4d   :  { %s3191_s0 = scalar_lea.vmem %s51_s13, 1024  ;;  %p3196_p8 = scmp.lt.s32.totalorder %s51_s13, %s51_s13 }
  0x4e   :  { %p3192_p7 = scmp.ne.s32.totalorder %s51_s13, %s3191_s0  ;;  %p3197_p9 = scmp.lt.s32.totalorder %s3191_s0, %s3191_s0 }
  0x50   :  { %p3198_p10 = por %p3197_p9, %p3196_p8 }
  0x52   :  { %p3199_p11 = pnand %p3198_p10, %p3192_p7 }
  0x54   :  { %3202 = shalt.err (!%p3199_p11)
}
  0x55   :  { %56 = dma.hbm_to_vmem [thread:$0]  %s4158_s2, 1024, %s51_s13, [#allocation6], %s3281_s29, %s3281_s29, %s3282_s30  }
  0x56   :  { %s3203_s24 = scalar_lea.hbm %s4161_s5, 1024 }
  0x57   :  { %p3204_p12 = scmp.ne.s32.totalorder %s4161_s5, %s3203_s24  ;;  %p3207_p13 = scmp.lt.u32.totalorder %s3203_s24, %s4161_s5 }
  0x59   :  { %p3209_p0 = pnand %p3207_p13, %p3204_p12 }
  0x5b   :  { %3212 = shalt.err (!%p3209_p0)
}
  0x5c   :  { %s3213_s12 = scalar_lea.vmem %s3426_s15, 1024  ;;  %p3218_p2 = scmp.lt.s32.totalorder %s3426_s15, %s3426_s15 }
  0x5d   :  { %p3214_p1 = scmp.ne.s32.totalorder %s3426_s15, %s3213_s12  ;;  %p3219_p3 = scmp.lt.s32.totalorder %s3213_s12, %s3213_s12 }
  0x5f   :  { %p3220_p4 = por %p3219_p3, %p3218_p2 }
  0x61   :  { %p3221_p5 = pnand %p3220_p4, %p3214_p1 }
  0x63   :  { %3224 = shalt.err (!%p3221_p5)
}
  0x64   :  { %82 = dma.hbm_to_vmem [thread:$0]  %s4161_s5, 1024, %s3426_s15, [#allocation9], %s3281_s29, %s3281_s29, %s3282_s30  }
  0x65   :  { %s3287_s14 = smov [#allocation13]   ;;  %s3225_s20 = scalar_lea.hbm %s4165_s9, 1024 }
  0x66   :  { %s104_s16 = sshll.u32 %s3287_s14, 4  ;;  %p3226_p6 = scmp.ne.s32.totalorder %s4165_s9, %s3225_s20  ;;  %s105_s16 = int_to_ptr.vmem [resolvable:$true] %s104_s16 }
  0x67   :  { %p3229_p7 = scmp.lt.u32.totalorder %s3225_s20, %s4165_s9 }
  0x69   :  { %p3231_p8 = pnand %p3229_p7, %p3226_p6 }
  0x6b   :  { %3234 = shalt.err (!%p3231_p8)
}
  0x6c   :  { %s3235_s27 = scalar_lea.vmem %s105_s16, 1024  ;;  %p3240_p10 = scmp.lt.s32.totalorder %s105_s16, %s105_s16 }
  0x6d   :  { %p3236_p9 = scmp.ne.s32.totalorder %s105_s16, %s3235_s27  ;;  %p3241_p11 = scmp.lt.s32.totalorder %s3235_s27, %s3235_s27 }
  0x6f   :  { %p3242_p12 = por %p3241_p11, %p3240_p10 }
  0x71   :  { %p3243_p13 = pnand %p3242_p12, %p3236_p9 }
  0x73   :  { %3246 = shalt.err (!%p3243_p13)
}
  0x74   :  { %110 = dma.hbm_to_vmem [thread:$0]  %s4165_s9, 1024, %s105_s16, [#allocation12], %s3281_s29, %s3281_s29, %s3282_s30  }
  0x75   :  { %3269 = dma.done.wait [#allocation3], 256  }
  0x76   :  { %3270 = vsyncadd [#allocation3], 4294967040 }
  0x77   :  { %3271 = dma.done.wait [#allocation6], 2048  }
  0x78   :  { %3272 = vsyncadd [#allocation6], 4294965248 }
  0x79   :  { %3273 = dma.done.wait [#allocation9], 1536  }
  0x7a   :  { %3274 = vsyncadd [#allocation9], 4294965760 }
  0x7b   :  { %3275 = dma.done.wait [#allocation12], 2048  }
  0x7c   :  { %3276 = vsyncadd [#allocation12], 4294965248  ;;  %v2919_v0 = vld [vmem:[#allocation10] sm:$0xff]   ;;  %v2920_v1 = vld [vmem:[#allocation10 + $0x8] sm:$0xff]   ;;  %vm188_vm0 = vcmask 523264   ;;  %v726_v36 = vlaneseq  ;;  %v3288_v40 = vmov 0.0  }
  0x7d   :  { %2474 = vmatprep.subr.bf16.mxu1 %v2919_v0  ;;  %v2921_v2 = vld [vmem:[#allocation10 + $0x10] sm:$0xff]   ;;  %v2922_v3 = vld [vmem:[#allocation10 + $0x18] sm:$0xff]   ;;  %v2927_v4 = vld [vmem:[#allocation5] sm:$0xff]   ;;  %s3289_s18 = smov [#allocation14]  }
  0x7e   :  { %2475 = vmatpush3.bf16.msra.mxu1 %v2919_v0  ;;  %2490 = vmatprep.mubr.bf16.mxu1 %v2927_v4  ;;  %v2923_v5 = vld [vmem:[#allocation10 + $0x20] sm:$0xff]   ;;  %v2924_v6 = vld [vmem:[#allocation10 + $0x28] sm:$0xff]   ;;  %v2925_v9 = vld [vmem:[#allocation10 + $0x30] sm:$0xff]   ;;  %v3480_v39 = vand.u32 127, %v726_v36  ;;  %s2179_s24 = sshll.u32 %s3289_s18, 4  ;;  %s2180_s24 = int_to_ptr.vmem [resolvable:$true] %s2179_s24 }
  0x7f   :  { %2476 = vmatprep.subr.bf16.mxu1 %v2920_v1  ;;  %v2935_v7 = vld [vmem:[#allocation8] sm:$0xff]   ;;  %v2936_v8 = vld [vmem:[#allocation8 + $0x8] sm:$0xff]   ;;  %v2937_v10 = vld [vmem:[#allocation8 + $0x10] sm:$0xff]   ;;  %s3247_s26 = scalar_lea.vmem %s2180_s24, 512  ;;  %p3252_p1 = scmp.lt.s32.totalorder %s2180_s24, %s2180_s24 }
  0x80   :  { %2462 = vmatprep.subr.bf16.mxu0 %v2935_v7  ;;  %v2939_v11 = vld [vmem:[#allocation2] sm:$0xff]   ;;  %v2926_v12 = vld [vmem:[#allocation10 + $0x38] sm:$0xff]   ;;  %v2928_v14 = vld [vmem:[#allocation5 + $0x8] sm:$0xff]   ;;  %vm1218_vm1 = vcmp.ge.s32.totalorder %v3480_v39, 48  ;;  %vm1219_vm2 = vcmp.lt.s32.totalorder %v3480_v39, 64  ;;  %vm1550_vm3 = vcmp.ge.s32.totalorder %v3480_v39, 80  ;;  %p3248_p0 = scmp.ne.s32.totalorder %s2180_s24, %s3247_s26  ;;  %p3253_p2 = scmp.lt.s32.totalorder %s3247_s26, %s3247_s26 }
  0x81   :  { %2463 = vmatpush3.bf16.msra.mxu0 %v2935_v7  ;;  %2470 = vmatprep.mubr.msk.bf16.mxu0 %vm188_vm0, %v2939_v11  ;;  %v2938_v13 = vld [vmem:[#allocation8 + $0x18] sm:$0xff]   ;;  %v2941_v15 = vld [vmem:[#allocation11] sm:$0xff]   ;;  %v2929_v16 = vld [vmem:[#allocation5 + $0x10] sm:$0xff]   ;;  %vm1551_vm4 = vcmp.lt.s32.totalorder %v3480_v39, 96  ;;  %vm1716_vm6 = vcmp.ge.s32.totalorder %v3480_v39, 96  ;;  %vm1717_vm8 = vcmp.lt.s32.totalorder %v3480_v39, 112 }
  0x82   :  { %2477 = vmatpush3.bf16.msra.mxu1 %v2920_v1  ;;  %2464 = vmatprep.subr.bf16.mxu0 %v2936_v8  ;;  %v2940_v17 = vld [vmem:[#allocation2 + $0x8] sm:$0xff]   ;;  %v2942_v18 = vld [vmem:[#allocation11 + $0x8] sm:$0xff]   ;;  %v2949_v19 = vld [vmem:[#allocation7] sm:$0xff]   ;;  %vm1882_vm9 = vcmp.ge.s32.totalorder %v3480_v39, 112  ;;  %vm1384_vm11 = vcmp.ge.s32.totalorder %v3480_v39, 64  ;;  %vm1385_vm12 = vcmp.lt.s32.totalorder %v3480_v39, 80  ;;  %p3254_p3 = por %p3253_p2, %p3252_p1 }
  0x83   :  { %2478 = vmatprep.subr.bf16.mxu1 %v2921_v2  ;;  %v2943_v20 = vld [vmem:[#allocation11 + $0x10] sm:$0xff]   ;;  %v2930_v21 = vld [vmem:[#allocation5 + $0x18] sm:$0xff]   ;;  %v2931_v22 = vld [vmem:[#allocation5 + $0x20] sm:$0xff]   ;;  %v3496_v43 = vsel %vm1882_vm9, 1.0, %v3288_v40  ;;  %vm841_vm14 = vcmp.ge.s32.totalorder %v3480_v39, 16  ;;  %vm842_vm15 = vcmp.lt.s32.totalorder %v3480_v39, 32 }
  0x84   :  { %v2944_v23 = vld [vmem:[#allocation11 + $0x18] sm:$0xff]   ;;  %v2945_v24 = vld [vmem:[#allocation11 + $0x20] sm:$0xff]   ;;  %v2932_v25 = vld [vmem:[#allocation5 + $0x28] sm:$0xff]   ;;  %p3255_p4 = pnand %p3254_p3, %p3248_p0 }
  0x85   :  { %2465 = vmatpush3.bf16.msra.mxu0 %v2936_v8  ;;  %v2933_v26 = vld [vmem:[#allocation5 + $0x30] sm:$0xff]   ;;  %v2946_v27 = vld [vmem:[#allocation11 + $0x28] sm:$0xff]   ;;  %v2934_v29 = vld [vmem:[#allocation5 + $0x38] sm:$0xff]  }
  0x86   :  { %2479 = vmatpush3.bf16.msra.mxu1 %v2921_v2  ;;  %2466 = vmatprep.subr.bf16.mxu0 %v2937_v10  ;;  %v2947_v28 = vld [vmem:[#allocation11 + $0x30] sm:$0xff]   ;;  %v2948_v30 = vld [vmem:[#allocation11 + $0x38] sm:$0xff]   ;;  %v2950_v31 = vld [vmem:[#allocation7 + $0x8] sm:$0xff]  }
  0x87   :  { %2480 = vmatprep.subr.bf16.mxu1 %v2922_v3  ;;  %v2951_v32 = vld [vmem:[#allocation7 + $0x10] sm:$0xff]   ;;  %v2952_v33 = vld [vmem:[#allocation7 + $0x18] sm:$0xff]   ;;  %v2953_v34 = vld [vmem:[#allocation7 + $0x20] sm:$0xff]  }
  0x88   :  { %v2954_v35 = vld [vmem:[#allocation7 + $0x28] sm:$0xff]   ;;  %v2955_v37 = vld [vmem:[#allocation7 + $0x30] sm:$0xff]   ;;  %v2956_v38 = vld [vmem:[#allocation7 + $0x38] sm:$0xff]  }
  0x89   :  { %2467 = vmatpush3.bf16.msra.mxu0 %v2937_v10  ;;  %vm1220_vm5 = vmand %vm1218_vm1, %vm1219_vm2  ;;  %v2194_v46 = vld [vmem:[%s4160_s4] ss:$0 sm:$0xff]  ;;  %vm1052_vm2 = vcmp.ge.s32.totalorder %v3480_v39, 32 }
  0x8a   :  { %2481 = vmatpush3.bf16.msra.mxu1 %v2922_v3  ;;  %2468 = vmatprep.subr.bf16.mxu0 %v2938_v13  ;;  %v3488_v41 = vsel %vm1220_vm5, 1.0, %v3288_v40  ;;  %vm1552_vm7 = vmand %vm1550_vm3, %vm1551_vm4  ;;  %v3515_v48 = vld [vmem:[%s4162_s6] ss:$0 sm:$0xff]  ;;  %vm1053_vm3 = vcmp.lt.s32.totalorder %v3480_v39, 48 }
  0x8b   :  { %2482 = vmatprep.subr.bf16.mxu1 %v2923_v5  ;;  %v3493_v42 = vsel %vm1552_vm7, 1.0, %v3288_v40  ;;  %vm1718_vm10 = vmand %vm1716_vm6, %vm1717_vm8 }
  0x8c   :  { %v3500_v44 = vsel %vm1718_vm10, 1.0, %v3288_v40  ;;  %vm1386_vm13 = vmand %vm1384_vm11, %vm1385_vm12 }
  0x8d   :  { %2469 = vmatpush3.bf16.msra.mxu0 %v2938_v13  ;;  %v3504_v45 = vsel %vm1386_vm13, 1.0, %v3288_v40  ;;  %vm843_vm1 = vmand %vm841_vm14, %vm842_vm15 }
  0x8e   :  { %2483 = vmatpush3.bf16.msra.mxu1 %v2923_v5  ;;  %2506 = vmatprep.subr.bf16.mxu0 %v2941_v15  ;;  %v2238_v52 = vsel %vm843_vm1, 1.0, %v3288_v40  ;;  %vm1054_vm4 = vmand %vm1052_vm2, %vm1053_vm3 }
  0x8f   :  { %2484 = vmatprep.subr.bf16.mxu1 %v2924_v6  ;;  %v3525_v2 = vpack.c.bf16 %v2238_v52, %v2238_v52 }
  0x90   :  { %2471 = vmatmul.mubr.msk.bf16.vlgmr.msra.gmra.mrb[0].mxu0 %vm188_vm0, %v2940_v17  ;;  %vm729_vm0 = vcmp.lt.s32.totalorder %v3480_v39, 16 }
  0x91   :  { %2507 = vmatpush3.bf16.msra.mxu0 %v2941_v15  ;;  %2522 = vmatprep.mubr.bf16.mxu0 %v2949_v19  ;;  %v2237_v49 = vsel %vm729_vm0, 1.0, %v3288_v40 }
  0x92   :  { %2485 = vmatpush3.bf16.msra.mxu1 %v2924_v6  ;;  %2508 = vmatprep.subr.bf16.mxu0 %v2942_v18  ;;  %v3521_v61 = vpack.c.bf16 %v2237_v49, %v2237_v49 }
  0x93   :  { %2486 = vmatprep.subr.bf16.mxu1 %v2925_v9 }
  0x95   :  { %2509 = vmatpush3.bf16.msra.mxu0 %v2942_v18 }
  0x96   :  { %2487 = vmatpush3.bf16.msra.mxu1 %v2925_v9  ;;  %2510 = vmatprep.subr.bf16.mxu0 %v2943_v20 }
  0x97   :  { %2488 = vmatprep.subr.bf16.mxu1 %v2926_v12 }
  0x99   :  { %2511 = vmatpush3.bf16.msra.mxu0 %v2943_v20 }
  0x9a   :  { %2489 = vmatpush3.bf16.msra.mxu1 %v2926_v12  ;;  %2512 = vmatprep.subr.bf16.mxu0 %v2944_v23 }
  0x9d   :  { %2491 = vmatmul.mubr.bf16.vlgmr.msra.gmra.mrb[0].mxu1 %v2928_v14  ;;  %2513 = vmatpush3.bf16.msra.mxu0 %v2944_v23 }
  0x9e   :  { %2494 = vmatprep.mubr.bf16.mxu1 %v2929_v16  ;;  %2514 = vmatprep.subr.bf16.mxu0 %v2945_v24 }
  0xa1   :  { %2515 = vmatpush3.bf16.msra.mxu0 %v2945_v24 }
  0xa2   :  { %2516 = vmatprep.subr.bf16.mxu0 %v2946_v27 }
  0xa5   :  { %2495 = vmatmul.mubr.bf16.gmra.mrb[4].mxu1 %v2930_v21  ;;  %2517 = vmatpush3.bf16.msra.mxu0 %v2946_v27 }
  0xa6   :  { %2498 = vmatprep.mubr.bf16.mxu1 %v2931_v22  ;;  %2518 = vmatprep.subr.bf16.mxu0 %v2947_v28 }
  0xa9   :  { %2519 = vmatpush3.bf16.msra.mxu0 %v2947_v28 }
  0xaa   :  { %2520 = vmatprep.subr.bf16.mxu0 %v2948_v30 }
  0xad   :  { %2499 = vmatmul.mubr.bf16.gmra.mrb[8].mxu1 %v2932_v25  ;;  %2521 = vmatpush3.bf16.msra.mxu0 %v2948_v30 }
  0xae   :  { %2502 = vmatprep.mubr.bf16.mxu1 %v2933_v26 }
  0xb0   :  { %2523 = vmatmul.mubr.bf16.vlgmr.msra.gmra.mrb[4].mxu0 %v2950_v31 }
  0xb1   :  { %2526 = vmatprep.mubr.bf16.mxu0 %v2951_v32 }
  0xb5   :  { %2503 = vmatmul.mubr.bf16.gmra.mrb[12].mxu1 %v2934_v29 }
  0xb8   :  { %2527 = vmatmul.mubr.bf16.gmra.mrb[8].mxu0 %v2952_v33 }
  0xb9   :  { %2530 = vmatprep.mubr.bf16.mxu0 %v2953_v34 }
  0xc0   :  { %2531 = vmatmul.mubr.bf16.gmra.mrb[12].mxu0 %v2954_v35 }
  0xc1   :  { %2534 = vmatprep.mubr.bf16.mxu0 %v2955_v37 }
  0xc8   :  { %2535 = vmatmul.mubr.bf16.gmra.mrb[16].mxu0 %v2956_v38 }
 0x163   :  { %v2472_v50 = vpop.f32.mrb[0].mxu0 }
 0x164   :  { %v238_v53 = vadd.f32 %v2472_v50, %v2194_v46  ;;  %v229_v54 = vpop.f32.mrb[1].mxu0 }
 0x165   :  { %v230_v56 = vadd.f32 %v2194_v46, %v229_v54  ;;  %v2473_v57 = vpop.f32.mrb[2].mxu0 }
 0x166   :  { %v241_v62 = vadd.f32 %v2473_v57, %v2194_v46  ;;  %v232_v63 = vpop.f32.mrb[3].mxu0 }
 0x167   :  { %v233_v3 = vadd.f32 %v2194_v46, %v232_v63 }
 0x168   :  { %v3529_v5 = vpack.c.bf16 %v241_v62, %v238_v53  ;;  %v2239_v62 = vsel %vm1054_vm4, 1.0, %v3288_v40 }
 0x169   :  { %v3533_v7 = vpack.c.bf16 %v233_v3, %v230_v56  ;;  %v3602_v3 = vpack.c.bf16 %v2239_v62, %v2239_v62 }
 0x16b   :  { %2554 = vmatprep.mubr.bf16.mxu1 %v3533_v7  ;;  %2574 = vmatprep.mubr.bf16.mxu0 %v3533_v7 }
 0x170   :  { %v2492_v47 = vpop.f32.mrb[0].mxu1 }
 0x171   :  { %v413_v51 = vpop.f32.mrb[1].mxu1  ;;  %v422_v58 = vadd.f32 %v2492_v47, %v3515_v48 }
 0x172   :  { %v2493_v55 = vpop.f32.mrb[2].mxu1  ;;  %v414_v0 = vadd.f32 %v3515_v48, %v413_v51 }
 0x173   :  { %v425_v59 = vadd.f32 %v2493_v55, %v3515_v48  ;;  %v416_v60 = vpop.f32.mrb[3].mxu1 }
 0x174   :  { %v417_v1 = vadd.f32 %v3515_v48, %v416_v60 }
 0x175   :  { %v3527_v4 = vpack.c.bf16 %v425_v59, %v422_v58 }
 0x176   :  { %v3531_v6 = vpack.c.bf16 %v417_v1, %v414_v0  ;;  %v3599_v0 = vld [vmem:[%s4164_s8] ss:$0 sm:$0xff] }
 0x177   :  { %v735_v13 = vmul.bf16 %v3521_v61, %v3527_v4  ;;  %v848_v14 = vmul.bf16 %v3525_v2, %v3527_v4 }
 0x178   :  { %v734_v8 = vmul.bf16 %v3521_v61, %v3531_v6  ;;  %v847_v9 = vmul.bf16 %v3525_v2, %v3531_v6  ;;  %v2496_v10 = vpop.f32.mrb[4].mxu1 }
 0x179   :  { %v438_v11 = vadd.f32 %v2496_v10, %v3515_v48  ;;  %v429_v12 = vpop.f32.mrb[5].mxu1 }
 0x17a   :  { %2538 = vmatprep.subr.bf16.mxu1 %v734_v8  ;;  %2558 = vmatprep.subr.bf16.mxu0 %v847_v9  ;;  %v430_v15 = vadd.f32 %v3515_v48, %v429_v12  ;;  %v2497_v16 = vpop.f32.mrb[6].mxu1 }
 0x17b   :  { %2539 = vmatpush3.bf16.xpose.msra.mxu1 %v734_v8  ;;  %2559 = vmatpush3.bf16.xpose.msra.mxu0 %v847_v9  ;;  %v441_v17 = vadd.f32 %v2497_v16, %v3515_v48  ;;  %v432_v18 = vpop.f32.mrb[7].mxu1 }
 0x17c   :  { %2540 = vmatprep.subr.bf16.mxu1 %v735_v13  ;;  %2560 = vmatprep.subr.bf16.mxu0 %v848_v14  ;;  %v433_v19 = vadd.f32 %v3515_v48, %v432_v18 }
 0x17d   :  { %v3549_v20 = vpack.c.bf16 %v441_v17, %v438_v11 }
 0x17e   :  { %v3551_v21 = vpack.c.bf16 %v433_v19, %v430_v15 }
 0x17f   :  { %v737_v37 = vmul.bf16 %v3521_v61, %v3549_v20  ;;  %v850_v38 = vmul.bf16 %v3525_v2, %v3549_v20 }
 0x180   :  { %v736_v22 = vmul.bf16 %v3521_v61, %v3551_v21  ;;  %v849_v23 = vmul.bf16 %v3525_v2, %v3551_v21  ;;  %v2500_v24 = vpop.f32.mrb[8].mxu1 }
 0x181   :  { %v454_v25 = vadd.f32 %v2500_v24, %v3515_v48  ;;  %v445_v26 = vpop.f32.mrb[9].mxu1 }
 0x182   :  { %v446_v27 = vadd.f32 %v3515_v48, %v445_v26  ;;  %v2501_v28 = vpop.f32.mrb[10].mxu1 }
 0x183   :  { %2541 = vmatpush3.bf16.xpose.msra.mxu1 %v735_v13  ;;  %2561 = vmatpush3.bf16.xpose.msra.mxu0 %v848_v14  ;;  %v457_v29 = vadd.f32 %v2501_v28, %v3515_v48  ;;  %v448_v30 = vpop.f32.mrb[11].mxu1  ;;  %v2524_v63 = vpop.f32.mrb[4].mxu0  ;;  %v1058_v13 = vmul.bf16 %v3602_v3, %v3531_v6 }
 0x184   :  { %2542 = vmatprep.subr.bf16.mxu1 %v736_v22  ;;  %2562 = vmatprep.subr.bf16.mxu0 %v849_v23  ;;  %v449_v31 = vadd.f32 %v3515_v48, %v448_v30  ;;  %v654_v39 = vadd.f32 %v2524_v63, %v3599_v0  ;;  %v645_v1 = vpop.f32.mrb[5].mxu0 }
 0x185   :  { %v3561_v32 = vpack.c.bf16 %v457_v29, %v454_v25  ;;  %v646_v8 = vadd.f32 %v3599_v0, %v645_v1  ;;  %v2525_v9 = vpop.f32.mrb[6].mxu0  ;;  %v1061_v1 = vmul.bf16 %v3602_v3, %v3549_v20 }
 0x186   :  { %v3563_v33 = vpack.c.bf16 %v449_v31, %v446_v27  ;;  %v657_v10 = vadd.f32 %v2525_v9, %v3599_v0  ;;  %v648_v11 = vpop.f32.mrb[7].mxu0  ;;  %v1059_v27 = vmul.bf16 %v3602_v3, %v3527_v4 }
 0x187   :  { %v739_v56 = vmul.bf16 %v3521_v61, %v3561_v32  ;;  %v649_v40 = vadd.f32 %v3599_v0, %v648_v11 }
 0x188   :  { %v2504_v34 = vpop.f32.mrb[12].mxu1  ;;  %v738_v54 = vmul.bf16 %v3521_v61, %v3563_v33  ;;  %v851_v55 = vmul.bf16 %v3525_v2, %v3563_v33  ;;  %v3607_v12 = vpack.c.bf16 %v657_v10, %v654_v39  ;;  %v1062_v11 = vmul.bf16 %v3602_v3, %v3563_v33 }
 0x189   :  { %v470_v35 = vadd.f32 %v2504_v34, %v3515_v48  ;;  %v461_v36 = vpop.f32.mrb[13].mxu1  ;;  %v3611_v14 = vpack.c.bf16 %v649_v40, %v646_v8 }
 0x18a   :  { %v462_v46 = vadd.f32 %v3515_v48, %v461_v36  ;;  %v2505_v47 = vpop.f32.mrb[14].mxu1  ;;  %v856_v29 = vmul.bf16 %v3525_v2, %v3607_v12 }
 0x18b   :  { %2543 = vmatpush3.bf16.xpose.msra.mxu1 %v736_v22  ;;  %2563 = vmatpush3.bf16.xpose.msra.mxu0 %v849_v23  ;;  %v473_v49 = vadd.f32 %v2505_v47, %v3515_v48  ;;  %v464_v50 = vpop.f32.mrb[15].mxu1  ;;  %v2528_v15 = vpop.f32.mrb[8].mxu0  ;;  %v855_v16 = vmul.bf16 %v3525_v2, %v3611_v14  ;;  %v3666_v40 = vmul.bf16 %v3521_v61, %v3611_v14 }
 0x18c   :  { %2544 = vmatprep.subr.bf16.mxu1 %v737_v37  ;;  %2564 = vmatprep.subr.bf16.mxu0 %v850_v38  ;;  %v465_v51 = vadd.f32 %v3515_v48, %v464_v50  ;;  %v852_v48 = vmul.bf16 %v3525_v2, %v3561_v32  ;;  %v670_v17 = vadd.f32 %v2528_v15, %v3599_v0  ;;  %v661_v18 = vpop.f32.mrb[9].mxu0 }
 0x18d   :  { %v3573_v52 = vpack.c.bf16 %v473_v49, %v470_v35  ;;  %v662_v19 = vadd.f32 %v3599_v0, %v661_v18  ;;  %v2529_v22 = vpop.f32.mrb[10].mxu0 }
 0x18e   :  { %v3575_v53 = vpack.c.bf16 %v465_v51, %v462_v46  ;;  %v673_v23 = vadd.f32 %v2529_v22, %v3599_v0  ;;  %v664_v24 = vpop.f32.mrb[11].mxu0  ;;  %v1060_v51 = vmul.bf16 %v3602_v3, %v3551_v21 }
 0x18f   :  { %v741_v59 = vmul.bf16 %v3521_v61, %v3573_v52  ;;  %v854_v60 = vmul.bf16 %v3525_v2, %v3573_v52  ;;  %v665_v25 = vadd.f32 %v3599_v0, %v664_v24  ;;  %v1065_v15 = vmul.bf16 %v3602_v3, %v3573_v52 }
 0x190   :  { %v740_v57 = vmul.bf16 %v3521_v61, %v3575_v53  ;;  %v853_v58 = vmul.bf16 %v3525_v2, %v3575_v53  ;;  %v3619_v26 = vpack.c.bf16 %v673_v23, %v670_v17 }
 0x191   :  { %v3625_v28 = vpack.c.bf16 %v665_v25, %v662_v19 }
 0x192   :  { %v858_v50 = vmul.bf16 %v3525_v2, %v3619_v26 }
 0x193   :  { %2545 = vmatpush3.bf16.xpose.msra.mxu1 %v737_v37  ;;  %2565 = vmatpush3.bf16.xpose.msra.mxu0 %v850_v38  ;;  %v2532_v30 = vpop.f32.mrb[12].mxu0  ;;  %v857_v35 = vmul.bf16 %v3525_v2, %v3625_v28 }
 0x194   :  { %2546 = vmatprep.subr.bf16.mxu1 %v738_v54  ;;  %2566 = vmatprep.subr.bf16.mxu0 %v851_v55  ;;  %v686_v31 = vadd.f32 %v2532_v30, %v3599_v0  ;;  %v677_v34 = vpop.f32.mrb[13].mxu0 }
 0x195   :  { %v678_v36 = vadd.f32 %v3599_v0, %v677_v34  ;;  %v2533_v37 = vpop.f32.mrb[14].mxu0 }
 0x196   :  { %v689_v38 = vadd.f32 %v2533_v37, %v3599_v0  ;;  %v680_v46 = vpop.f32.mrb[15].mxu0 }
 0x197   :  { %v681_v47 = vadd.f32 %v3599_v0, %v680_v46 }
 0x198   :  { %v3636_v49 = vpack.c.bf16 %v689_v38, %v686_v31  ;;  %v3721_v38 = vpack.c.bf16 %v3500_v44, %v3500_v44 }
 0x19a   :  { %v860_v39 = vmul.bf16 %v3525_v2, %v3636_v49  ;;  %4173 = vst [vmem:[#allocation20_spill] sm:$0xff] %v3721_v38  ;;  %v1722_v46 = vmul.bf16 %v3721_v38, %v3531_v6  ;;  %v1725_v44 = vmul.bf16 %v3721_v38, %v3549_v20 }
 0x19b   :  { %2547 = vmatpush3.bf16.xpose.msra.mxu1 %v738_v54  ;;  %2567 = vmatpush3.bf16.xpose.msra.mxu0 %v851_v55  ;;  %v3642_v54 = vpack.c.bf16 %v681_v47, %v678_v36  ;;  %v2536_v55 = vpop.f32.mrb[16].mxu0  ;;  %v1723_v47 = vmul.bf16 %v3721_v38, %v3527_v4 }
 0x19c   :  { %2548 = vmatprep.subr.bf16.mxu1 %v739_v56  ;;  %2568 = vmatprep.subr.bf16.mxu0 %v852_v48 }
 0x1a3   :  { %2549 = vmatpush3.bf16.xpose.msra.mxu1 %v739_v56  ;;  %2569 = vmatpush3.bf16.xpose.msra.mxu0 %v852_v48  ;;  %v859_v56 = vmul.bf16 %v3525_v2, %v3642_v54  ;;  %v702_v48 = vadd.f32 %v2536_v55, %v3599_v0 }
 0x1a4   :  { %2550 = vmatprep.subr.bf16.mxu1 %v740_v57  ;;  %2570 = vmatprep.subr.bf16.mxu0 %v853_v58 }
 0x1ab   :  { %2551 = vmatpush3.bf16.xpose.msra.mxu1 %v740_v57  ;;  %2571 = vmatpush3.bf16.xpose.msra.mxu0 %v853_v58  ;;  %v693_v57 = vpop.f32.mrb[17].mxu0 }
 0x1ac   :  { %2552 = vmatprep.subr.bf16.mxu1 %v741_v59  ;;  %2572 = vmatprep.subr.bf16.mxu0 %v854_v60  ;;  %v694_v58 = vadd.f32 %v3599_v0, %v693_v57 }
 0x1b3   :  { %2553 = vmatpush3.bf16.xpose.msra.mxu1 %v741_v59  ;;  %2573 = vmatpush3.bf16.xpose.msra.mxu0 %v854_v60  ;;  %v2537_v59 = vpop.f32.mrb[18].mxu0 }
 0x1b4   :  { %2618 = vmatprep.subr.bf16.mxu0 %v1058_v13  ;;  %2578 = vmatprep.subr.bf16.mxu1 %v855_v16  ;;  %v705_v60 = vadd.f32 %v2537_v59, %v3599_v0  ;;  %v696_v62 = vpop.f32.mrb[19].mxu0 }
 0x1b5   :  { %v697_v63 = vadd.f32 %v3599_v0, %v696_v62  ;;  %v1726_v62 = vmul.bf16 %v3721_v38, %v3563_v33 }
 0x1b6   :  { %v3654_v8 = vpack.c.bf16 %v705_v60, %v702_v48 }
 0x1b7   :  { %v3656_v9 = vpack.c.bf16 %v697_v63, %v694_v58  ;;  %v1727_v63 = vmul.bf16 %v3721_v38, %v3561_v32 }
 0x1b8   :  { %v862_v0 = vmul.bf16 %v3525_v2, %v3654_v8 }
 0x1b9   :  { %v861_v10 = vmul.bf16 %v3525_v2, %v3656_v9  ;;  %v1064_v2 = vmul.bf16 %v3602_v3, %v3575_v53 }
 0x1ba   :  { %2555 = vmatmul.mubr.bf16.vlgmr.msra.gmra.mrb[16].mxu1 %v3529_v5  ;;  %2575 = vmatmul.mubr.bf16.vlgmr.msra.gmra.mrb[20].mxu0 %v3529_v5 }
 0x1bb   :  { %2619 = vmatpush3.bf16.xpose.msra.mxu0 %v1058_v13  ;;  %2634 = vmatprep.mubr.bf16.mxu0 %v3533_v7  ;;  %v1063_v13 = vmul.bf16 %v3602_v3, %v3561_v32 }
 0x1bc   :  { %2620 = vmatprep.subr.bf16.mxu0 %v1059_v27  ;;  %2579 = vmatpush3.bf16.msra.mxu1 %v855_v16  ;;  %v3677_v16 = vpack.c.bf16 %v3488_v41, %v3488_v41 }
 0x1bd   :  { %2580 = vmatprep.subr.bf16.mxu1 %v856_v29 }
 0x1be   :  { %v1224_v17 = vmul.bf16 %v3677_v16, %v3531_v6  ;;  %v1225_v18 = vmul.bf16 %v3677_v16, %v3527_v4  ;;  %v1226_v19 = vmul.bf16 %v3677_v16, %v3551_v21  ;;  %v1227_v41 = vmul.bf16 %v3677_v16, %v3549_v20 }
 0x1bf   :  { %v1228_v22 = vmul.bf16 %v3677_v16, %v3563_v33  ;;  %v1229_v23 = vmul.bf16 %v3677_v16, %v3561_v32  ;;  %v1230_v24 = vmul.bf16 %v3677_v16, %v3575_v53  ;;  %v1231_v25 = vmul.bf16 %v3677_v16, %v3573_v52 }
 0x1c0   :  { %2581 = vmatpush3.bf16.msra.mxu1 %v856_v29 }
 0x1c1   :  { %2582 = vmatprep.subr.bf16.mxu1 %v857_v35 }
 0x1c3   :  { %2621 = vmatpush3.bf16.xpose.msra.mxu0 %v1059_v27  ;;  %v3699_v27 = vpack.c.bf16 %v3493_v42, %v3493_v42 }
 0x1c4   :  { %2622 = vmatprep.subr.bf16.mxu0 %v1060_v51  ;;  %2583 = vmatpush3.bf16.msra.mxu1 %v857_v35 }
 0x1c5   :  { %2584 = vmatprep.subr.bf16.mxu1 %v858_v50  ;;  %v1556_v29 = vmul.bf16 %v3699_v27, %v3531_v6  ;;  %v1557_v30 = vmul.bf16 %v3699_v27, %v3527_v4  ;;  %v1558_v31 = vmul.bf16 %v3699_v27, %v3551_v21  ;;  %v1559_v42 = vmul.bf16 %v3699_v27, %v3549_v20 }
 0x1c6   :  { %v1560_v34 = vmul.bf16 %v3699_v27, %v3563_v33  ;;  %v1561_v35 = vmul.bf16 %v3699_v27, %v3561_v32  ;;  %v1562_v36 = vmul.bf16 %v3699_v27, %v3575_v53  ;;  %v1563_v37 = vmul.bf16 %v3699_v27, %v3573_v52 }
 0x1c8   :  { %2585 = vmatpush3.bf16.msra.mxu1 %v858_v50  ;;  %v1724_v50 = vmul.bf16 %v3721_v38, %v3551_v21 }
 0x1c9   :  { %2586 = vmatprep.subr.bf16.mxu1 %v859_v56 }
 0x1cb   :  { %2623 = vmatpush3.bf16.xpose.msra.mxu0 %v1060_v51 }
 0x1cc   :  { %2624 = vmatprep.subr.bf16.mxu0 %v1061_v1  ;;  %2587 = vmatpush3.bf16.msra.mxu1 %v859_v56 }
 0x1cd   :  { %2588 = vmatprep.subr.bf16.mxu1 %v860_v39 }
 0x1d0   :  { %2589 = vmatpush3.bf16.msra.mxu1 %v860_v39  ;;  %v1728_v39 = vmul.bf16 %v3721_v38, %v3575_v53 }
 0x1d1   :  { %2590 = vmatprep.subr.bf16.mxu1 %v861_v10 }
 0x1d3   :  { %2625 = vmatpush3.bf16.xpose.msra.mxu0 %v1061_v1  ;;  %v1729_v1 = vmul.bf16 %v3721_v38, %v3573_v52 }
 0x1d4   :  { %2626 = vmatprep.subr.bf16.mxu0 %v1062_v11  ;;  %2591 = vmatpush3.bf16.msra.mxu1 %v861_v10  ;;  %v3767_v10 = vpack.c.bf16 %v3496_v43, %v3496_v43 }
 0x1d5   :  { %2592 = vmatprep.subr.bf16.mxu1 %v862_v0 }
 0x1d6   :  { %4174 = vst [vmem:[#allocation21_spill] sm:$0xff] %v3767_v10  ;;  %v1891_v43 = vmul.bf16 %v3767_v10, %v3549_v20 }
 0x1d8   :  { %2593 = vmatpush3.bf16.msra.mxu1 %v862_v0  ;;  %v1888_v0 = vmul.bf16 %v3767_v10, %v3531_v6 }
 0x1d9   :  { %2598 = vmatprep.subr.bf16.mxu1 %v3666_v40 }
 0x1db   :  { %2627 = vmatpush3.bf16.xpose.msra.mxu0 %v1062_v11  ;;  %v1889_v11 = vmul.bf16 %v3767_v10, %v3527_v4 }
 0x1dc   :  { %2628 = vmatprep.subr.bf16.mxu0 %v1063_v13 }
 0x1e3   :  { %2629 = vmatpush3.bf16.xpose.msra.mxu0 %v1063_v13  ;;  %v1890_v13 = vmul.bf16 %v3767_v10, %v3551_v21 }
 0x1e4   :  { %2630 = vmatprep.subr.bf16.mxu0 %v1064_v2 }
 0x1eb   :  { %2631 = vmatpush3.bf16.xpose.msra.mxu0 %v1064_v2 }
 0x1ec   :  { %2632 = vmatprep.subr.bf16.mxu0 %v1065_v15 }
 0x1f3   :  { %2633 = vmatpush3.bf16.xpose.msra.mxu0 %v1065_v15 }
 0x1f4   :  { %2658 = vmatprep.subr.bf16.mxu0 %v1224_v17 }
 0x1fa   :  { %2635 = vmatmul.mubr.bf16.vlgmr.msra.gmra.mrb[24].mxu0 %v3529_v5 }
 0x1fb   :  { %2659 = vmatpush3.bf16.xpose.msra.mxu0 %v1224_v17  ;;  %2674 = vmatprep.mubr.bf16.mxu0 %v3533_v7 }
 0x1fc   :  { %2660 = vmatprep.subr.bf16.mxu0 %v1225_v18 }
 0x203   :  { %2661 = vmatpush3.bf16.xpose.msra.mxu0 %v1225_v18 }
 0x204   :  { %2662 = vmatprep.subr.bf16.mxu0 %v1226_v19 }
 0x20b   :  { %2663 = vmatpush3.bf16.xpose.msra.mxu0 %v1226_v19  ;;  %v1892_v19 = vmul.bf16 %v3767_v10, %v3563_v33 }
 0x20c   :  { %2664 = vmatprep.subr.bf16.mxu0 %v1227_v41 }
 0x213   :  { %2665 = vmatpush3.bf16.xpose.msra.mxu0 %v1227_v41  ;;  %v1893_v41 = vmul.bf16 %v3767_v10, %v3561_v32 }
 0x214   :  { %2666 = vmatprep.subr.bf16.mxu0 %v1228_v22 }
 0x21b   :  { %2667 = vmatpush3.bf16.xpose.msra.mxu0 %v1228_v22  ;;  %v1894_v22 = vmul.bf16 %v3767_v10, %v3575_v53 }
 0x21c   :  { %2668 = vmatprep.subr.bf16.mxu0 %v1229_v23 }
 0x223   :  { %2669 = vmatpush3.bf16.xpose.msra.mxu0 %v1229_v23  ;;  %v1895_v23 = vmul.bf16 %v3767_v10, %v3573_v52 }
 0x224   :  { %2670 = vmatprep.subr.bf16.mxu0 %v1230_v24 }
 0x22b   :  { %2671 = vmatpush3.bf16.xpose.msra.mxu0 %v1230_v24 }
 0x22c   :  { %2672 = vmatprep.subr.bf16.mxu0 %v1231_v25 }
 0x233   :  { %2673 = vmatpush3.bf16.xpose.msra.mxu0 %v1231_v25 }
 0x234   :  { %2738 = vmatprep.subr.bf16.mxu0 %v1556_v29 }
 0x23a   :  { %2675 = vmatmul.mubr.bf16.vlgmr.msra.gmra.mrb[28].mxu0 %v3529_v5 }
 0x23b   :  { %2739 = vmatpush3.bf16.xpose.msra.mxu0 %v1556_v29  ;;  %2754 = vmatprep.mubr.bf16.mxu0 %v3533_v7 }
 0x23c   :  { %2740 = vmatprep.subr.bf16.mxu0 %v1557_v30 }
 0x243   :  { %2741 = vmatpush3.bf16.xpose.msra.mxu0 %v1557_v30 }
 0x244   :  { %2742 = vmatprep.subr.bf16.mxu0 %v1558_v31 }
 0x24b   :  { %2743 = vmatpush3.bf16.xpose.msra.mxu0 %v1558_v31 }
 0x24c   :  { %2744 = vmatprep.subr.bf16.mxu0 %v1559_v42 }
 0x253   :  { %2745 = vmatpush3.bf16.xpose.msra.mxu0 %v1559_v42 }
 0x254   :  { %2746 = vmatprep.subr.bf16.mxu0 %v1560_v34 }
 0x25b   :  { %2747 = vmatpush3.bf16.xpose.msra.mxu0 %v1560_v34 }
 0x25c   :  { %2748 = vmatprep.subr.bf16.mxu0 %v1561_v35 }
 0x263   :  { %2749 = vmatpush3.bf16.xpose.msra.mxu0 %v1561_v35 }
 0x264   :  { %2750 = vmatprep.subr.bf16.mxu0 %v1562_v36 }
 0x26b   :  { %2751 = vmatpush3.bf16.xpose.msra.mxu0 %v1562_v36 }
 0x26c   :  { %2752 = vmatprep.subr.bf16.mxu0 %v1563_v37 }
 0x273   :  { %2753 = vmatpush3.bf16.xpose.msra.mxu0 %v1563_v37 }
 0x274   :  { %2778 = vmatprep.subr.bf16.mxu0 %v1722_v46 }
 0x27a   :  { %2755 = vmatmul.mubr.bf16.vlgmr.msra.gmra.mrb[32].mxu0 %v3529_v5 }
 0x27b   :  { %2779 = vmatpush3.bf16.xpose.msra.mxu0 %v1722_v46  ;;  %2794 = vmatprep.mubr.bf16.mxu0 %v3533_v7 }
 0x27c   :  { %2780 = vmatprep.subr.bf16.mxu0 %v1723_v47 }
 0x283   :  { %2781 = vmatpush3.bf16.xpose.msra.mxu0 %v1723_v47 }
 0x284   :  { %2782 = vmatprep.subr.bf16.mxu0 %v1724_v50 }
 0x28b   :  { %2783 = vmatpush3.bf16.xpose.msra.mxu0 %v1724_v50 }
 0x28c   :  { %2784 = vmatprep.subr.bf16.mxu0 %v1725_v44 }
 0x28d   :  { %v3733_v51 = vpop.f32.mrb[16].mxu1  ;;  %v3735_v55 = vpop.f32.mrb[20].mxu0 }
 0x28e   :  { %916 = vmax.xlane.f32.xlu1 %v3735_v55  ;;  %v3738_v56 = vpop.f32.mrb[17].mxu1  ;;  %v3740_v48 = vpop.f32.mrb[21].mxu0 }
 0x28f   :  { %912 = vmax.xlane.f32.xlu0 %v3740_v48  ;;  %v3743_v57 = vpop.f32.mrb[18].mxu1  ;;  %v3745_v58 = vpop.f32.mrb[22].mxu0 }
 0x290   :  { %v3747_v59 = vpop.f32.mrb[19].mxu1  ;;  %v3749_v60 = vpop.f32.mrb[23].mxu0 }
 0x292   :  { %918 = vmax.xlane.f32.xlu1 %v3745_v58 }
 0x293   :  { %2785 = vmatpush3.bf16.xpose.msra.mxu0 %v1725_v44  ;;  %914 = vmax.xlane.f32.xlu0 %v3749_v60 }
 0x294   :  { %2786 = vmatprep.subr.bf16.mxu0 %v1726_v62 }
 0x296   :  { %801 = vmax.xlane.f32.xlu1 %v3747_v59 }
 0x297   :  { %799 = vmax.xlane.f32.xlu0 %v3738_v56 }
 0x29a   :  { %805 = vmax.xlane.f32.xlu1 %v3743_v57 }
 0x29b   :  { %2787 = vmatpush3.bf16.xpose.msra.mxu0 %v1726_v62  ;;  %803 = vmax.xlane.f32.xlu0 %v3733_v51 }
 0x29c   :  { %2788 = vmatprep.subr.bf16.mxu0 %v1727_v63 }
 0x2a3   :  { %2789 = vmatpush3.bf16.xpose.msra.mxu0 %v1727_v63 }
 0x2a4   :  { %2790 = vmatprep.subr.bf16.mxu0 %v1728_v39 }
 0x2ab   :  { %2791 = vmatpush3.bf16.xpose.msra.mxu0 %v1728_v39 }
 0x2ac   :  { %2792 = vmatprep.subr.bf16.mxu0 %v1729_v1 }
 0x2b3   :  { %2793 = vmatpush3.bf16.xpose.msra.mxu0 %v1729_v1 }
 0x2b4   :  { %2818 = vmatprep.subr.bf16.mxu0 %v1888_v0 }
 0x2ba   :  { %2795 = vmatmul.mubr.bf16.vlgmr.msra.gmra.mrb[36].mxu0 %v3529_v5 }
 0x2bb   :  { %2819 = vmatpush3.bf16.xpose.msra.mxu0 %v1888_v0  ;;  %2834 = vmatprep.mubr.bf16.mxu0 %v3533_v7 }
 0x2bc   :  { %2820 = vmatprep.subr.bf16.mxu0 %v1889_v11 }
 0x2c3   :  { %2821 = vmatpush3.bf16.xpose.msra.mxu0 %v1889_v11 }
 0x2c4   :  { %2822 = vmatprep.subr.bf16.mxu0 %v1890_v13 }
 0x2cb   :  { %2823 = vmatpush3.bf16.xpose.msra.mxu0 %v1890_v13 }
 0x2cc   :  { %2824 = vmatprep.subr.bf16.mxu0 %v1891_v43 }
 0x2cd   :  { %v3779_v2 = vpop.f32.mrb[24].mxu0 }
 0x2ce   :  { %v3781_v15 = vpop.f32.mrb[25].mxu0 }
 0x2cf   :  { %v3783_v17 = vpop.f32.mrb[26].mxu0  ;;  %1123 = vmax.xlane.f32.xlu0 %v3781_v15 }
 0x2d0   :  { %v3786_v18 = vpop.f32.mrb[27].mxu0 }
 0x2d1   :  { %1125 = vmax.xlane.f32.xlu1 %v3786_v18 }
 0x2d3   :  { %2825 = vmatpush3.bf16.xpose.msra.mxu0 %v1891_v43  ;;  %1127 = vmax.xlane.f32.xlu0 %v3779_v2 }
 0x2d4   :  { %2826 = vmatprep.subr.bf16.mxu0 %v1892_v19 }
 0x2d5   :  { %1129 = vmax.xlane.f32.xlu1 %v3783_v17 }
 0x2db   :  { %2827 = vmatpush3.bf16.xpose.msra.mxu0 %v1892_v19 }
 0x2dc   :  { %2828 = vmatprep.subr.bf16.mxu0 %v1893_v41 }
 0x2e3   :  { %2829 = vmatpush3.bf16.xpose.msra.mxu0 %v1893_v41 }
 0x2e4   :  { %2830 = vmatprep.subr.bf16.mxu0 %v1894_v22 }
 0x2eb   :  { %2831 = vmatpush3.bf16.xpose.msra.mxu0 %v1894_v22 }
 0x2ec   :  { %2832 = vmatprep.subr.bf16.mxu0 %v1895_v23 }
 0x2f3   :  { %2833 = vmatpush3.bf16.xpose.msra.mxu0 %v1895_v23 }
 0x2fa   :  { %2835 = vmatmul.mubr.bf16.vlgmr.msra.gmra.mrb[40].mxu0 %v3529_v5 }
 0x30d   :  { %v3800_v24 = vpop.f32.mrb[28].mxu0 }
 0x30e   :  { %v3802_v25 = vpop.f32.mrb[29].mxu0 }
 0x30f   :  { %v3804_v29 = vpop.f32.mrb[30].mxu0 }
 0x310   :  { %v3806_v30 = vpop.f32.mrb[31].mxu0 }
 0x31b   :  { %v917_v31 = vpop.xlane.xlu1 %916 }
 0x31c   :  { %v3809_v42 = vsub.f32 %v3735_v55, %v917_v31  ;;  %v913_v34 = vpop.xlane.xlu0 %912 }
 0x31d   :  { %v3812_v35 = vsub.f32 %v3740_v48, %v913_v34 }
 0x31e   :  { %v928_v46 = vmul.f32 1.442695, %v3809_v42 }
 0x31f   :  { %v924_v36 = vmul.f32 1.442695, %v3812_v35  ;;  %v919_v37 = vpop.xlane.xlu1 %918 }
 0x320   :  { %v915_v47 = vpop.xlane.xlu0 %914  ;;  %v3817_v50 = vsub.f32 %v3745_v58, %v919_v37 }
 0x321   :  { %2965 = vpow2.f32 %v924_v36  ;;  %v3820_v44 = vsub.f32 %v3749_v60, %v915_v47 }
 0x322   :  { %2967 = vpow2.f32 %v928_v46  ;;  %v930_v48 = vmul.f32 1.442695, %v3817_v50 }
 0x323   :  { %v926_v55 = vmul.f32 1.442695, %v3820_v44  ;;  %v802_v63 = vpop.xlane.xlu1 %801 }
 0x324   :  { %v800_v62 = vpop.xlane.xlu0 %799  ;;  %v3828_v58 = vsub.f32 %v3747_v59, %v802_v63 }
 0x325   :  { %2969 = vpow2.f32 %v926_v55  ;;  %v3825_v39 = vsub.f32 %v3738_v56, %v800_v62 }
 0x326   :  { %2971 = vpow2.f32 %v930_v48  ;;  %v813_v41 = vmul.f32 1.442695, %v3828_v58 }
 0x327   :  { %v811_v60 = vmul.f32 1.442695, %v3825_v39  ;;  %v806_v43 = vpop.xlane.xlu1 %805 }
 0x328   :  { %v804_v1 = vpop.xlane.xlu0 %803  ;;  %v3836_v56 = vsub.f32 %v3743_v57, %v806_v43 }
 0x329   :  { %v3832_v11 = vsub.f32 %v3733_v51, %v804_v1  ;;  %2973 = vpow2.f32 %v811_v60 }
 0x32a   :  { %2975 = vpow2.f32 %v813_v41  ;;  %v817_v51 = vmul.f32 1.442695, %v3836_v56 }
 0x32b   :  { %v2966_v0 = vpop.eup %2965  ;;  %v815_v59 = vmul.f32 1.442695, %v3832_v11 }
 0x32c   :  { %932 = vadd.xlane.f32.xlu0 %v2966_v0  ;;  %v2968_v13 = vpop.eup %2967 }
 0x32d   :  { %2977 = vpow2.f32 %v815_v59 }
 0x32e   :  { %2979 = vpow2.f32 %v817_v51 }
 0x32f   :  { %v2970_v19 = vpop.eup %2969 }
 0x330   :  { %936 = vadd.xlane.f32.xlu0 %v2968_v13  ;;  %934 = vadd.xlane.f32.xlu1 %v2970_v19  ;;  %v2972_v22 = vpop.eup %2971 }
 0x333   :  { %v2974_v23 = vpop.eup %2973 }
 0x334   :  { %1289 = vmax.xlane.f32.xlu0 %v3802_v25  ;;  %938 = vadd.xlane.f32.xlu1 %v2972_v22  ;;  %v2976_v57 = vpop.eup %2975 }
 0x337   :  { %v2978_v31 = vpop.eup %2977 }
 0x338   :  { %1293 = vmax.xlane.f32.xlu0 %v3800_v24  ;;  %1291 = vmax.xlane.f32.xlu1 %v3806_v30  ;;  %v2980_v34 = vpop.eup %2979 }
 0x33c   :  { %819 = vadd.xlane.f32.xlu0 %v2974_v23  ;;  %1295 = vmax.xlane.f32.xlu1 %v3804_v29 }
 0x340   :  { %823 = vadd.xlane.f32.xlu0 %v2978_v31  ;;  %821 = vadd.xlane.f32.xlu1 %v2976_v57 }
 0x344   :  { %825 = vadd.xlane.f32.xlu1 %v2980_v34 }
 0x34d   :  { %v3844_v36 = vpop.f32.mrb[32].mxu0 }
 0x34e   :  { %v3846_v37 = vpop.f32.mrb[33].mxu0 }
 0x34f   :  { %v3848_v46 = vpop.f32.mrb[34].mxu0 }
 0x350   :  { %v3850_v47 = vpop.f32.mrb[35].mxu0 }
 0x35c   :  { %v1124_v55 = vpop.xlane.xlu0 %1123 }
 0x35d   :  { %v3853_v62 = vsub.f32 %v3781_v15, %v1124_v55 }
 0x35e   :  { %v1126_v48 = vpop.xlane.xlu1 %1125 }
 0x35f   :  { %v1135_v63 = vmul.f32 1.442695, %v3853_v62  ;;  %v3857_v1 = vsub.f32 %v3786_v18, %v1126_v48 }
 0x360   :  { %v1128_v0 = vpop.xlane.xlu0 %1127 }
 0x361   :  { %2981 = vpow2.f32 %v1135_v63  ;;  %v1137_v60 = vmul.f32 1.442695, %v3857_v1  ;;  %v3861_v13 = vsub.f32 %v3779_v2, %v1128_v0 }
 0x362   :  { %v1130_v43 = vpop.xlane.xlu1 %1129 }
 0x363   :  { %2983 = vpow2.f32 %v1137_v60  ;;  %v1139_v19 = vmul.f32 1.442695, %v3861_v13  ;;  %v3865_v15 = vsub.f32 %v3783_v17, %v1130_v43 }
 0x365   :  { %2985 = vpow2.f32 %v1139_v19  ;;  %v1141_v41 = vmul.f32 1.442695, %v3865_v15 }
 0x367   :  { %2987 = vpow2.f32 %v1141_v41 }
 0x36b   :  { %v2982_v18 = vpop.eup %2981 }
 0x36c   :  { %1143 = vadd.xlane.f32.xlu0 %v2982_v18 }
 0x36d   :  { %v2984_v59 = vpop.eup %2983 }
 0x36e   :  { %1145 = vadd.xlane.f32.xlu1 %v2984_v59 }
 0x36f   :  { %v2986_v22 = vpop.eup %2985 }
 0x370   :  { %1147 = vadd.xlane.f32.xlu0 %v2986_v22 }
 0x371   :  { %v2988_v51 = vpop.eup %2987 }
 0x372   :  { %1149 = vadd.xlane.f32.xlu1 %v2988_v51 }
 0x38d   :  { %v3868_v2 = vpop.f32.mrb[36].mxu0 }
 0x38e   :  { %v3870_v23 = vpop.f32.mrb[37].mxu0 }
 0x38f   :  { %v3872_v57 = vpop.f32.mrb[38].mxu0 }
 0x390   :  { %4175 = vst [vmem:[#allocation22_spill] sm:$0xff] %v3872_v57  ;;  %v3874_v17 = vpop.f32.mrb[39].mxu0 }
 0x3b9   :  { %v933_v31 = vpop.xlane.xlu0 %932 }
 0x3ba   :  { %2989 = vlog2.f32 %v933_v31 }
 0x3bd   :  { %v937_v34 = vpop.xlane.xlu0 %936  ;;  %v935_v55 = vpop.xlane.xlu1 %934 }
 0x3be   :  { %2991 = vlog2.f32 %v937_v34 }
 0x3bf   :  { %2993 = vlog2.f32 %v935_v55 }
 0x3c1   :  { %v1290_v48 = vpop.xlane.xlu0 %1289  ;;  %v939_v63 = vpop.xlane.xlu1 %938 }
 0x3c2   :  { %v3877_v0 = vsub.f32 %v3802_v25, %v1290_v48  ;;  %2995 = vlog2.f32 %v939_v63 }
 0x3c4   :  { %v1301_v60 = vmul.f32 1.442695, %v3877_v0  ;;  %v2990_v43 = vpop.eup %2989 }
 0x3c5   :  { %v1294_v19 = vpop.xlane.xlu0 %1293  ;;  %v1292_v41 = vpop.xlane.xlu1 %1291  ;;  %v941_v51 = vmul.f32 0.6931472, %v2990_v43 }
 0x3c6   :  { %2997 = vpow2.f32 %v1301_v60  ;;  %v3881_v18 = vsub.f32 %v3800_v24, %v1294_v19  ;;  %v3884_v59 = vsub.f32 %v3806_v30, %v1292_v41 }
 0x3c7   :  { %v948_v30 = vsub.f32 %v3812_v35, %v941_v51 }
 0x3c8   :  { %v2992_v22 = vpop.eup %2991  ;;  %v1305_v31 = vmul.f32 1.442695, %v3881_v18  ;;  %v1303_v25 = vmul.f32 1.442695, %v3884_v59 }
 0x3c9   :  { %v2994_v34 = vpop.eup %2993  ;;  %v820_v55 = vpop.xlane.xlu0 %819  ;;  %v945_v60 = vmul.f32 0.6931472, %v2992_v22 }
 0x3ca   :  { %v1296_v48 = vpop.xlane.xlu1 %1295  ;;  %v943_v63 = vmul.f32 0.6931472, %v2994_v34  ;;  %2999 = vpow2.f32 %v1305_v31 }
 0x3cb   :  { %v3889_v10 = vsub.f32 %v3804_v29, %v1296_v48  ;;  %3001 = vpow2.f32 %v1303_v25  ;;  %v950_v29 = vsub.f32 %v3809_v42, %v945_v60 }
 0x3cc   :  { %v2996_v24 = vpop.eup %2995  ;;  %v949_v19 = vsub.f32 %v3820_v44, %v943_v63  ;;  %3003 = vlog2.f32 %v820_v55  ;;  %v743_v55 = vmul.bf16 %v3521_v61, %v3607_v12 }
 0x3cd   :  { %v1307_v43 = vmul.f32 1.442695, %v3889_v10  ;;  %v947_v41 = vmul.f32 0.6931472, %v2996_v24  ;;  %v3894_v38 = vpop.f32.mrb[40].mxu0 }
 0x3ce   :  { %v822_v57 = vpop.xlane.xlu1 %821  ;;  %v3896_v34 = vpop.f32.mrb[41].mxu0  ;;  %v952_v31 = vpack.c.bf16 %v949_v19, %v948_v30 }
 0x3cf   :  { %3005 = vpow2.f32 %v1307_v43  ;;  %v951_v22 = vsub.f32 %v3817_v50, %v947_v41  ;;  %v3900_v25 = vpop.f32.mrb[42].mxu0  ;;  %v744_v50 = vmul.bf16 %v3521_v61, %v3625_v28  ;;  %v824_v19 = vpop.xlane.xlu0 %823 }
 0x3d0   :  { %v2998_v35 = vpop.eup %2997  ;;  %3007 = vlog2.f32 %v822_v57  ;;  %2594 = vmatprep.mubr.bf16.mxu1 %v952_v31  ;;  %v3902_v44 = vpop.f32.mrb[43].mxu0 }
 0x3d1   :  { %v953_v51 = vpack.c.bf16 %v951_v22, %v950_v29  ;;  %1309 = vadd.xlane.f32.xlu0 %v2998_v35  ;;  %v746_v22 = vmul.bf16 %v3521_v61, %v3642_v54  ;;  %v747_v35 = vmul.bf16 %v3521_v61, %v3636_v49 }
 0x3d2   :  { %v826_v24 = vpop.xlane.xlu1 %825 }
 0x3d3   :  { %2595 = vmatmul.mubr.bf16.vlgmr.msra.gmra.mrb[20].mxu1 %v953_v51  ;;  %3009 = vlog2.f32 %v826_v24  ;;  %v1067_v24 = vmul.bf16 %v3602_v3, %v3607_v12 }
 0x3d4   :  { %v3000_v48 = vpop.eup %2999  ;;  %2599 = vmatpush3.bf16.msra.mxu1 %v3666_v40  ;;  %v745_v40 = vmul.bf16 %v3521_v61, %v3619_v26  ;;  %3011 = vlog2.f32 %v824_v19 }
 0x3d5   :  { %v3002_v63 = vpop.eup %3001  ;;  %2600 = vmatprep.subr.bf16.mxu1 %v743_v55  ;;  %1313 = vadd.xlane.f32.xlu0 %v3000_v48 }
 0x3d6   :  { %v3004_v42 = vpop.eup %3003  ;;  %1311 = vadd.xlane.f32.xlu1 %v3002_v63  ;;  %v749_v63 = vmul.bf16 %v3521_v61, %v3654_v8 }
 0x3d7   :  { %v828_v60 = vmul.f32 0.6931472, %v3004_v42 }
 0x3d8   :  { %2601 = vmatpush3.bf16.msra.mxu1 %v743_v55 }
 0x3d9   :  { %v3006_v57 = vpop.eup %3005  ;;  %2602 = vmatprep.subr.bf16.mxu1 %v744_v50  ;;  %v835_v41 = vsub.f32 %v3825_v39, %v828_v60  ;;  %v748_v39 = vmul.bf16 %v3521_v61, %v3656_v9  ;;  %v1068_v61 = vmul.bf16 %v3602_v3, %v3625_v28 }
 0x3da   :  { %v3008_v30 = vpop.eup %3007  ;;  %1315 = vadd.xlane.f32.xlu1 %v3006_v57  ;;  %v1066_v57 = vmul.bf16 %v3602_v3, %v3611_v14 }
 0x3db   :  { %v830_v43 = vmul.f32 0.6931472, %v3008_v30  ;;  %v1069_v30 = vmul.bf16 %v3602_v3, %v3619_v26 }
 0x3dc   :  { %2603 = vmatpush3.bf16.msra.mxu1 %v744_v50 }
 0x3dd   :  { %v836_v31 = vsub.f32 %v3828_v58, %v830_v43  ;;  %2604 = vmatprep.subr.bf16.mxu1 %v745_v40  ;;  %v3010_v51 = vpop.eup %3009 }
 0x3de   :  { %v3012_v55 = vpop.eup %3011  ;;  %v834_v58 = vmul.f32 0.6931472, %v3010_v51  ;;  %v1072_v51 = vmul.bf16 %v3602_v3, %v3656_v9 }
 0x3df   :  { %v839_v29 = vpack.c.bf16 %v836_v31, %v835_v41  ;;  %v832_v48 = vmul.f32 0.6931472, %v3012_v55  ;;  %v1071_v41 = vmul.bf16 %v3602_v3, %v3636_v49 }
 0x3e0   :  { %2605 = vmatpush3.bf16.msra.mxu1 %v745_v40  ;;  %v838_v42 = vsub.f32 %v3836_v56, %v834_v58  ;;  %v1070_v40 = vmul.bf16 %v3602_v3, %v3642_v54 }
 0x3e1   :  { %2614 = vmatprep.mubr.bf16.mxu1 %v839_v29  ;;  %2606 = vmatprep.subr.bf16.mxu1 %v746_v22  ;;  %v837_v50 = vsub.f32 %v3832_v11, %v832_v48 }
 0x3e3   :  { %v840_v60 = vpack.c.bf16 %v838_v42, %v837_v50  ;;  %v1073_v50 = vmul.bf16 %v3602_v3, %v3654_v8  ;;  %v1234_v3 = vmul.bf16 %v3677_v16, %v3625_v28 }
 0x3e4   :  { %2607 = vmatpush3.bf16.msra.mxu1 %v746_v22 }
 0x3e5   :  { %2608 = vmatprep.subr.bf16.mxu1 %v747_v35 }
 0x3e8   :  { %2609 = vmatpush3.bf16.msra.mxu1 %v747_v35 }
 0x3e9   :  { %2610 = vmatprep.subr.bf16.mxu1 %v748_v39 }
 0x3ec   :  { %2611 = vmatpush3.bf16.msra.mxu1 %v748_v39 }
 0x3ed   :  { %2612 = vmatprep.subr.bf16.mxu1 %v749_v63 }
 0x3f0   :  { %2613 = vmatpush3.bf16.msra.mxu1 %v749_v63 }
 0x3f1   :  { %2638 = vmatprep.subr.bf16.mxu1 %v1066_v57 }
 0x3f3   :  { %2615 = vmatmul.mubr.bf16.vlgmr.msra.gmra.mrb[20].mxu1 %v840_v60 }
 0x3f4   :  { %2639 = vmatpush3.bf16.msra.mxu1 %v1066_v57 }
 0x3f5   :  { %2640 = vmatprep.subr.bf16.mxu1 %v1067_v24 }
 0x3f8   :  { %2641 = vmatpush3.bf16.msra.mxu1 %v1067_v24 }
 0x3f9   :  { %2642 = vmatprep.subr.bf16.mxu1 %v1068_v61  ;;  %v1144_v56 = vpop.xlane.xlu0 %1143 }
 0x3fa   :  { %3013 = vlog2.f32 %v1144_v56  ;;  %v1237_v56 = vmul.bf16 %v3677_v16, %v3636_v49 }
 0x3fb   :  { %v1146_v11 = vpop.xlane.xlu1 %1145 }
 0x3fc   :  { %2643 = vmatpush3.bf16.msra.mxu1 %v1068_v61  ;;  %3015 = vlog2.f32 %v1146_v11  ;;  %v1238_v11 = vmul.bf16 %v3677_v16, %v3656_v9 }
 0x3fd   :  { %2644 = vmatprep.subr.bf16.mxu1 %v1069_v30  ;;  %v1148_v19 = vpop.xlane.xlu0 %1147 }
 0x3fe   :  { %3017 = vlog2.f32 %v1148_v19  ;;  %v3961_v19 = vpack.c.bf16 %v3504_v45, %v3504_v45 }
 0x3ff   :  { %v1150_v43 = vpop.xlane.xlu1 %1149 }
 0x400   :  { %2645 = vmatpush3.bf16.msra.mxu1 %v1069_v30  ;;  %3019 = vlog2.f32 %v1150_v43  ;;  %v1239_v30 = vmul.bf16 %v3677_v16, %v3654_v8  ;;  %v1390_v43 = vmul.bf16 %v3961_v19, %v3531_v6 }
 0x401   :  { %2646 = vmatprep.subr.bf16.mxu1 %v1070_v40 }
 0x404   :  { %v3014_v31 = vpop.eup %3013  ;;  %2647 = vmatpush3.bf16.msra.mxu1 %v1070_v40 }
 0x405   :  { %v1152_v29 = vmul.f32 0.6931472, %v3014_v31  ;;  %2648 = vmatprep.subr.bf16.mxu1 %v1071_v41 }
 0x406   :  { %v3016_v22 = vpop.eup %3015 }
 0x407   :  { %v1154_v35 = vmul.f32 0.6931472, %v3016_v22  ;;  %v1159_v55 = vsub.f32 %v3853_v62, %v1152_v29  ;;  %v1232_v62 = vmul.bf16 %v3677_v16, %v3611_v14 }
 0x408   :  { %v3018_v39 = vpop.eup %3017  ;;  %2649 = vmatpush3.bf16.msra.mxu1 %v1071_v41 }
 0x409   :  { %v1160_v58 = vsub.f32 %v3857_v1, %v1154_v35  ;;  %v1156_v48 = vmul.f32 0.6931472, %v3018_v39  ;;  %2650 = vmatprep.subr.bf16.mxu1 %v1072_v51  ;;  %v1233_v1 = vmul.bf16 %v3677_v16, %v3607_v12 }
 0x40a   :  { %v3020_v63 = vpop.eup %3019 }
 0x40b   :  { %v1158_v42 = vmul.f32 0.6931472, %v3020_v63  ;;  %v1163_v57 = vpack.c.bf16 %v1160_v58, %v1159_v55  ;;  %v1161_v60 = vsub.f32 %v3861_v13, %v1156_v48  ;;  %v1235_v13 = vmul.bf16 %v3677_v16, %v3619_v26 }
 0x40c   :  { %2651 = vmatpush3.bf16.msra.mxu1 %v1072_v51 }
 0x40d   :  { %v1162_v24 = vsub.f32 %v3865_v15, %v1158_v42  ;;  %2652 = vmatprep.subr.bf16.mxu1 %v1073_v50  ;;  %2654 = vmatprep.mubr.bf16.mxu1 %v1163_v57  ;;  %v1236_v15 = vmul.bf16 %v3677_v16, %v3642_v54 }
 0x40f   :  { %v1164_v61 = vpack.c.bf16 %v1162_v24, %v1161_v60  ;;  %v1391_v60 = vmul.bf16 %v3961_v19, %v3527_v4  ;;  %v1395_v4 = vmul.bf16 %v3961_v19, %v3561_v32  ;;  %v1399_v32 = vmul.bf16 %v3961_v19, %v3607_v12 }
 0x410   :  { %2653 = vmatpush3.bf16.msra.mxu1 %v1073_v50  ;;  %v1405_v24 = vmul.bf16 %v3961_v19, %v3654_v8 }
 0x411   :  { %2678 = vmatprep.subr.bf16.mxu1 %v1232_v62 }
 0x413   :  { %2655 = vmatmul.mubr.bf16.vlgmr.msra.gmra.mrb[20].mxu1 %v1164_v61  ;;  %v4003_v61 = vmul.bf16 %v3699_v27, %v3611_v14 }
 0x414   :  { %2679 = vmatpush3.bf16.msra.mxu1 %v1232_v62 }
 0x415   :  { %2680 = vmatprep.subr.bf16.mxu1 %v1233_v1 }
 0x418   :  { %2681 = vmatpush3.bf16.msra.mxu1 %v1233_v1 }
 0x419   :  { %2682 = vmatprep.subr.bf16.mxu1 %v1234_v3 }
 0x41c   :  { %2683 = vmatpush3.bf16.msra.mxu1 %v1234_v3 }
 0x41d   :  { %2684 = vmatprep.subr.bf16.mxu1 %v1235_v13 }
 0x420   :  { %2685 = vmatpush3.bf16.msra.mxu1 %v1235_v13 }
 0x421   :  { %2686 = vmatprep.subr.bf16.mxu1 %v1236_v15 }
 0x424   :  { %2687 = vmatpush3.bf16.msra.mxu1 %v1236_v15  ;;  %v4176_v15 = vld [vmem:[#allocation22_spill] sm:$0xff] }
 0x425   :  { %2688 = vmatprep.subr.bf16.mxu1 %v1237_v56 }
 0x428   :  { %2689 = vmatpush3.bf16.msra.mxu1 %v1237_v56 }
 0x429   :  { %2690 = vmatprep.subr.bf16.mxu1 %v1238_v11 }
 0x42c   :  { %2691 = vmatpush3.bf16.msra.mxu1 %v1238_v11 }
 0x42d   :  { %2692 = vmatprep.subr.bf16.mxu1 %v1239_v30 }
 0x430   :  { %2693 = vmatpush3.bf16.msra.mxu1 %v1239_v30 }
 0x431   :  { %2698 = vmatprep.subr.bf16.mxu1 %v1390_v43 }
 0x45e   :  { %v1310_v40 = vpop.xlane.xlu0 %1309 }
 0x45f   :  { %3021 = vlog2.f32 %v1310_v40 }
 0x462   :  { %v1314_v41 = vpop.xlane.xlu0 %1313 }
 0x463   :  { %3023 = vlog2.f32 %v1314_v41  ;;  %v1312_v31 = vpop.xlane.xlu1 %1311 }
 0x464   :  { %3025 = vlog2.f32 %v1312_v31 }
 0x467   :  { %v1316_v29 = vpop.xlane.xlu1 %1315 }
 0x468   :  { %3027 = vlog2.f32 %v1316_v29 }
 0x469   :  { %v3022_v16 = vpop.eup %3021 }
 0x46a   :  { %v1318_v35 = vmul.f32 0.6931472, %v3022_v16 }
 0x46c   :  { %v1325_v39 = vsub.f32 %v3877_v0, %v1318_v35  ;;  %v1392_v0 = vmul.bf16 %v3961_v19, %v3551_v21  ;;  %v1398_v21 = vmul.bf16 %v3961_v19, %v3611_v14 }
 0x46d   :  { %v3024_v22 = vpop.eup %3023 }
 0x46e   :  { %v3026_v45 = vpop.eup %3025  ;;  %v1322_v55 = vmul.f32 0.6931472, %v3024_v22 }
 0x46f   :  { %v1320_v51 = vmul.f32 0.6931472, %v3026_v45 }
 0x470   :  { %v1327_v42 = vsub.f32 %v3881_v18, %v1322_v55  ;;  %v1393_v18 = vmul.bf16 %v3961_v19, %v3549_v20  ;;  %v1397_v20 = vmul.bf16 %v3961_v19, %v3573_v52  ;;  %v1401_v52 = vmul.bf16 %v3961_v19, %v3619_v26 }
 0x471   :  { %v1326_v6 = vsub.f32 %v3884_v59, %v1320_v51  ;;  %v1404_v59 = vmul.bf16 %v3961_v19, %v3656_v9 }
 0x472   :  { %v3028_v58 = vpop.eup %3027 }
 0x473   :  { %v1324_v48 = vmul.f32 0.6931472, %v3028_v58  ;;  %v1329_v63 = vpack.c.bf16 %v1326_v6, %v1325_v39 }
 0x475   :  { %v1328_v50 = vsub.f32 %v3889_v10, %v1324_v48  ;;  %2694 = vmatprep.mubr.bf16.mxu1 %v1329_v63  ;;  %v1394_v10 = vmul.bf16 %v3961_v19, %v3563_v33  ;;  %v1400_v33 = vmul.bf16 %v3961_v19, %v3625_v28 }
 0x477   :  { %v1330_v57 = vpack.c.bf16 %v1328_v50, %v1327_v42 }
 0x479   :  { %2695 = vmatmul.mubr.bf16.vlgmr.msra.gmra.mrb[20].mxu1 %v1330_v57 }
 0x47a   :  { %2699 = vmatpush3.bf16.xpose.msra.mxu1 %v1390_v43  ;;  %2714 = vmatprep.mubr.bf16.mxu1 %v3533_v7  ;;  %v1396_v7 = vmul.bf16 %v3961_v19, %v3575_v53  ;;  %v1402_v53 = vmul.bf16 %v3961_v19, %v3642_v54 }
 0x47b   :  { %2700 = vmatprep.subr.bf16.mxu1 %v1391_v60 }
 0x482   :  { %2701 = vmatpush3.bf16.xpose.msra.mxu1 %v1391_v60 }
 0x483   :  { %2702 = vmatprep.subr.bf16.mxu1 %v1392_v0 }
 0x48a   :  { %2703 = vmatpush3.bf16.xpose.msra.mxu1 %v1392_v0 }
 0x48b   :  { %2704 = vmatprep.subr.bf16.mxu1 %v1393_v18 }
 0x492   :  { %2705 = vmatpush3.bf16.xpose.msra.mxu1 %v1393_v18 }
 0x493   :  { %2706 = vmatprep.subr.bf16.mxu1 %v1394_v10 }
 0x49a   :  { %2707 = vmatpush3.bf16.xpose.msra.mxu1 %v1394_v10 }
 0x49b   :  { %2708 = vmatprep.subr.bf16.mxu1 %v1395_v4 }
 0x4a2   :  { %2709 = vmatpush3.bf16.xpose.msra.mxu1 %v1395_v4 }
 0x4a3   :  { %2710 = vmatprep.subr.bf16.mxu1 %v1396_v7 }
 0x4aa   :  { %2711 = vmatpush3.bf16.xpose.msra.mxu1 %v1396_v7 }
 0x4ab   :  { %2712 = vmatprep.subr.bf16.mxu1 %v1397_v20 }
 0x4b2   :  { %2713 = vmatpush3.bf16.xpose.msra.mxu1 %v1397_v20 }
 0x4b3   :  { %2718 = vmatprep.subr.bf16.mxu1 %v1398_v21 }
 0x4b9   :  { %2715 = vmatmul.mubr.bf16.vlgmr.msra.gmra.mrb[24].mxu1 %v3529_v5  ;;  %v1403_v5 = vmul.bf16 %v3961_v19, %v3636_v49 }
 0x4ba   :  { %2719 = vmatpush3.bf16.msra.mxu1 %v1398_v21 }
 0x4bb   :  { %2720 = vmatprep.subr.bf16.mxu1 %v1399_v32 }
 0x4be   :  { %2721 = vmatpush3.bf16.msra.mxu1 %v1399_v32 }
 0x4bf   :  { %2722 = vmatprep.subr.bf16.mxu1 %v1400_v33 }
 0x4c2   :  { %2723 = vmatpush3.bf16.msra.mxu1 %v1400_v33 }
 0x4c3   :  { %2724 = vmatprep.subr.bf16.mxu1 %v1401_v52 }
 0x4c6   :  { %2725 = vmatpush3.bf16.msra.mxu1 %v1401_v52 }
 0x4c7   :  { %2726 = vmatprep.subr.bf16.mxu1 %v1402_v53 }
 0x4ca   :  { %2727 = vmatpush3.bf16.msra.mxu1 %v1402_v53 }
 0x4cb   :  { %2728 = vmatprep.subr.bf16.mxu1 %v1403_v5 }
 0x4ce   :  { %2729 = vmatpush3.bf16.msra.mxu1 %v1403_v5 }
 0x4cf   :  { %2730 = vmatprep.subr.bf16.mxu1 %v1404_v59 }
 0x4d2   :  { %2731 = vmatpush3.bf16.msra.mxu1 %v1404_v59 }
 0x4d3   :  { %2732 = vmatprep.subr.bf16.mxu1 %v1405_v24 }
 0x4d6   :  { %2733 = vmatpush3.bf16.msra.mxu1 %v1405_v24 }
 0x4d7   :  { %2758 = vmatprep.subr.bf16.mxu1 %v4003_v61 }
 0x58c   :  { %v2716_v62 = vpop.f32.mrb[24].mxu1 }
 0x58d   :  { %v1440_v1 = vpop.f32.mrb[25].mxu1 }
 0x58e   :  { %1455 = vmax.xlane.f32.xlu0 %v1440_v1  ;;  %v2717_v3 = vpop.f32.mrb[26].mxu1 }
 0x58f   :  { %v1443_v13 = vpop.f32.mrb[27].mxu1 }
 0x590   :  { %1457 = vmax.xlane.f32.xlu1 %v1443_v13 }
 0x592   :  { %1459 = vmax.xlane.f32.xlu0 %v2716_v62 }
 0x594   :  { %1461 = vmax.xlane.f32.xlu1 %v2717_v3 }
 0x596   :  { %1621 = vmax.xlane.f32.xlu0 %v3846_v37 }
 0x598   :  { %1623 = vmax.xlane.f32.xlu1 %v3850_v47 }
 0x59a   :  { %1625 = vmax.xlane.f32.xlu0 %v3844_v36 }
 0x59c   :  { %1627 = vmax.xlane.f32.xlu1 %v3848_v46 }
 0x59e   :  { %1787 = vmax.xlane.f32.xlu0 %v3870_v23 }
 0x5a0   :  { %1789 = vmax.xlane.f32.xlu1 %v3874_v17 }
 0x5a2   :  { %1791 = vmax.xlane.f32.xlu0 %v3868_v2 }
 0x5a4   :  { %1793 = vmax.xlane.f32.xlu1 %v4176_v15 }
 0x61b   :  { %v1456_v56 = vpop.xlane.xlu0 %1455 }
 0x61c   :  { %v4014_v11 = vsub.f32 %v1440_v1, %v1456_v56 }
 0x61d   :  { %v1458_v30 = vpop.xlane.xlu1 %1457 }
 0x61e   :  { %v1467_v19 = vmul.f32 1.442695, %v4014_v11  ;;  %v4017_v43 = vsub.f32 %v1443_v13, %v1458_v30 }
 0x61f   :  { %v1460_v40 = vpop.xlane.xlu0 %1459 }
 0x620   :  { %3029 = vpow2.f32 %v1467_v19  ;;  %v1469_v41 = vmul.f32 1.442695, %v4017_v43  ;;  %v4020_v31 = vsub.f32 %v2716_v62, %v1460_v40 }
 0x621   :  { %v1462_v29 = vpop.xlane.xlu1 %1461 }
 0x622   :  { %3031 = vpow2.f32 %v1469_v41  ;;  %v1471_v16 = vmul.f32 1.442695, %v4020_v31  ;;  %v4023_v22 = vsub.f32 %v2717_v3, %v1462_v29 }
 0x623   :  { %v1622_v35 = vpop.xlane.xlu0 %1621 }
 0x624   :  { %3033 = vpow2.f32 %v1471_v16  ;;  %v1473_v45 = vmul.f32 1.442695, %v4023_v22  ;;  %v4027_v55 = vsub.f32 %v3846_v37, %v1622_v35 }
 0x625   :  { %v1624_v51 = vpop.xlane.xlu1 %1623 }
 0x626   :  { %3035 = vpow2.f32 %v1473_v45  ;;  %v4030_v48 = vsub.f32 %v3850_v47, %v1624_v51  ;;  %v1633_v50 = vmul.f32 1.442695, %v4027_v55 }
 0x627   :  { %v1626_v39 = vpop.xlane.xlu0 %1625 }
 0x628   :  { %v4034_v57 = vsub.f32 %v3844_v36, %v1626_v39  ;;  %v1635_v18 = vmul.f32 1.442695, %v4030_v48  ;;  %3037 = vpow2.f32 %v1633_v50 }
 0x629   :  { %v1628_v6 = vpop.xlane.xlu1 %1627 }
 0x62a   :  { %v3030_v58 = vpop.eup %3029  ;;  %v4038_v37 = vsub.f32 %v3848_v46, %v1628_v6  ;;  %v1637_v47 = vmul.f32 1.442695, %v4034_v57  ;;  %3039 = vpow2.f32 %v1635_v18 }
 0x62b   :  { %1475 = vadd.xlane.f32.xlu0 %v3030_v58  ;;  %v1788_v63 = vpop.xlane.xlu0 %1787 }
 0x62c   :  { %v3032_v42 = vpop.eup %3031  ;;  %v4042_v4 = vsub.f32 %v3870_v23, %v1788_v63  ;;  %v1639_v36 = vmul.f32 1.442695, %v4038_v37  ;;  %3041 = vpow2.f32 %v1637_v47 }
 0x62d   :  { %1477 = vadd.xlane.f32.xlu1 %v3032_v42  ;;  %v1790_v60 = vpop.xlane.xlu1 %1789 }
 0x62e   :  { %v3034_v0 = vpop.eup %3033  ;;  %v4046_v20 = vsub.f32 %v3874_v17, %v1790_v60  ;;  %v1799_v46 = vmul.f32 1.442695, %v4042_v4  ;;  %3043 = vpow2.f32 %v1639_v36 }
 0x62f   :  { %1479 = vadd.xlane.f32.xlu0 %v3034_v0  ;;  %v1792_v7 = vpop.xlane.xlu0 %1791 }
 0x630   :  { %v3036_v10 = vpop.eup %3035  ;;  %v4051_v32 = vsub.f32 %v3868_v2, %v1792_v7  ;;  %v1801_v23 = vmul.f32 1.442695, %v4046_v20  ;;  %3045 = vpow2.f32 %v1799_v46 }
 0x631   :  { %1481 = vadd.xlane.f32.xlu1 %v3036_v10  ;;  %v1794_v21 = vpop.xlane.xlu1 %1793 }
 0x632   :  { %v4056_v33 = vsub.f32 %v4176_v15, %v1794_v21  ;;  %v1803_v17 = vmul.f32 1.442695, %v4051_v32  ;;  %v3038_v52 = vpop.eup %3037  ;;  %3047 = vpow2.f32 %v1801_v23 }
 0x633   :  { %1953 = vmax.xlane.f32.xlu0 %v3896_v34 }
 0x634   :  { %v1805_v2 = vmul.f32 1.442695, %v4056_v33  ;;  %v3040_v53 = vpop.eup %3039  ;;  %3049 = vpow2.f32 %v1803_v17 }
 0x635   :  { %1955 = vmax.xlane.f32.xlu1 %v3902_v44 }
 0x636   :  { %v3042_v5 = vpop.eup %3041  ;;  %3051 = vpow2.f32 %v1805_v2 }
 0x637   :  { %1957 = vmax.xlane.f32.xlu0 %v3894_v38 }
 0x638   :  { %v3044_v59 = vpop.eup %3043 }
 0x639   :  { %1959 = vmax.xlane.f32.xlu1 %v3900_v25 }
 0x63a   :  { %v3046_v24 = vpop.eup %3045 }
 0x63b   :  { %1641 = vadd.xlane.f32.xlu0 %v3038_v52 }
 0x63c   :  { %v3048_v62 = vpop.eup %3047 }
 0x63d   :  { %1643 = vadd.xlane.f32.xlu1 %v3040_v53 }
 0x63e   :  { %v3050_v1 = vpop.eup %3049 }
 0x63f   :  { %1645 = vadd.xlane.f32.xlu0 %v3042_v5 }
 0x640   :  { %v3052_v3 = vpop.eup %3051 }
 0x641   :  { %1647 = vadd.xlane.f32.xlu1 %v3044_v59 }
 0x643   :  { %1807 = vadd.xlane.f32.xlu0 %v3046_v24 }
 0x645   :  { %1809 = vadd.xlane.f32.xlu1 %v3048_v62 }
 0x647   :  { %1811 = vadd.xlane.f32.xlu0 %v3050_v1 }
 0x649   :  { %1813 = vadd.xlane.f32.xlu1 %v3052_v3 }
 0x6b8   :  { %v1476_v13 = vpop.xlane.xlu0 %1475 }
 0x6b9   :  { %3053 = vlog2.f32 %v1476_v13 }
 0x6ba   :  { %v1478_v15 = vpop.xlane.xlu1 %1477 }
 0x6bb   :  { %3055 = vlog2.f32 %v1478_v15 }
 0x6bc   :  { %v1480_v56 = vpop.xlane.xlu0 %1479 }
 0x6bd   :  { %3057 = vlog2.f32 %v1480_v56 }
 0x6be   :  { %v1482_v30 = vpop.xlane.xlu1 %1481 }
 0x6bf   :  { %3059 = vlog2.f32 %v1482_v30  ;;  %v1568_v30 = vmul.bf16 %v3699_v27, %v3642_v54 }
 0x6c0   :  { %v1954_v19 = vpop.xlane.xlu0 %1953 }
 0x6c1   :  { %v4063_v40 = vsub.f32 %v3896_v34, %v1954_v19  ;;  %v1569_v19 = vmul.bf16 %v3699_v27, %v3636_v49 }
 0x6c2   :  { %v1956_v41 = vpop.xlane.xlu1 %1955 }
 0x6c3   :  { %v3054_v29 = vpop.eup %3053  ;;  %v1965_v16 = vmul.f32 1.442695, %v4063_v40  ;;  %v4067_v35 = vsub.f32 %v3902_v44, %v1956_v41  ;;  %v1570_v41 = vmul.bf16 %v3699_v27, %v3656_v9 }
 0x6c4   :  { %v1484_v45 = vmul.f32 0.6931472, %v3054_v29  ;;  %v1958_v51 = vpop.xlane.xlu0 %1957 }
 0x6c5   :  { %v3056_v39 = vpop.eup %3055  ;;  %3061 = vpow2.f32 %v1965_v16  ;;  %v1967_v6 = vmul.f32 1.442695, %v4067_v35  ;;  %v4071_v58 = vsub.f32 %v3894_v38, %v1958_v51 }
 0x6c6   :  { %v1486_v63 = vmul.f32 0.6931472, %v3056_v39  ;;  %v1960_v42 = vpop.xlane.xlu1 %1959  ;;  %v1491_v44 = vsub.f32 %v4014_v11, %v1484_v45 }
 0x6c7   :  { %v3058_v34 = vpop.eup %3057  ;;  %3063 = vpow2.f32 %v1967_v6  ;;  %v1969_v50 = vmul.f32 1.442695, %v4071_v58  ;;  %v4075_v60 = vsub.f32 %v3900_v25, %v1960_v42  ;;  %v1571_v6 = vmul.bf16 %v3699_v27, %v3654_v8 }
 0x6c8   :  { %v1492_v0 = vsub.f32 %v4017_v43, %v1486_v63  ;;  %v1488_v18 = vmul.f32 0.6931472, %v3058_v34  ;;  %v1642_v10 = vpop.xlane.xlu0 %1641  ;;  %v1565_v43 = vmul.bf16 %v3699_v27, %v3607_v12 }
 0x6c9   :  { %v3060_v47 = vpop.eup %3059  ;;  %3065 = vpow2.f32 %v1969_v50  ;;  %v1971_v38 = vmul.f32 1.442695, %v4075_v60 }
 0x6ca   :  { %v1490_v7 = vmul.f32 0.6931472, %v3060_v47  ;;  %3067 = vlog2.f32 %v1642_v10  ;;  %v1644_v36 = vpop.xlane.xlu1 %1643  ;;  %v1495_v21 = vpack.c.bf16 %v1492_v0, %v1491_v44  ;;  %v1493_v46 = vsub.f32 %v4020_v31, %v1488_v18  ;;  %v4177_v44 = vld [vmem:[#allocation20_spill] sm:$0xff] }
 0x6cb   :  { %3069 = vpow2.f32 %v1971_v38  ;;  %v1730_v0 = vmul.bf16 %v4177_v44, %v3611_v14  ;;  %v1734_v38 = vmul.bf16 %v4177_v44, %v3642_v54 }
 0x6cc   :  { %v1494_v25 = vsub.f32 %v4023_v22, %v1490_v7  ;;  %3071 = vlog2.f32 %v1644_v36  ;;  %2734 = vmatprep.mubr.bf16.mxu1 %v1495_v21  ;;  %v1646_v53 = vpop.xlane.xlu0 %1645  ;;  %v1566_v22 = vmul.bf16 %v3699_v27, %v3625_v28  ;;  %v1735_v7 = vmul.bf16 %v4177_v44, %v3636_v49 }
 0x6cd   :  { %v1736_v21 = vmul.bf16 %v4177_v44, %v3656_v9 }
 0x6ce   :  { %v1496_v11 = vpack.c.bf16 %v1494_v25, %v1493_v46  ;;  %v1648_v52 = vpop.xlane.xlu1 %1647 }
 0x6cf   :  { %v3062_v23 = vpop.eup %3061  ;;  %3073 = vlog2.f32 %v1648_v52  ;;  %v4178_v52 = vld [vmem:[#allocation21_spill] sm:$0xff] }
 0x6d0   :  { %1973 = vadd.xlane.f32.xlu0 %v3062_v23  ;;  %2735 = vmatmul.mubr.bf16.vlgmr.msra.gmra.mrb[20].mxu1 %v1496_v11  ;;  %v1808_v15 = vpop.xlane.xlu0 %1807  ;;  %v1737_v23 = vmul.bf16 %v4177_v44, %v3654_v8 }
 0x6d1   :  { %v3064_v17 = vpop.eup %3063  ;;  %2759 = vmatpush3.bf16.msra.mxu1 %v4003_v61  ;;  %v1567_v61 = vmul.bf16 %v3699_v27, %v3619_v26  ;;  %v1731_v27 = vmul.bf16 %v4177_v44, %v3607_v12 }
 0x6d2   :  { %2760 = vmatprep.subr.bf16.mxu1 %v1565_v43  ;;  %1975 = vadd.xlane.f32.xlu1 %v3064_v17  ;;  %v1810_v1 = vpop.xlane.xlu1 %1809 }
 0x6d3   :  { %v3066_v2 = vpop.eup %3065  ;;  %3075 = vlog2.f32 %v1810_v1 }
 0x6d4   :  { %v3068_v31 = vpop.eup %3067  ;;  %1977 = vadd.xlane.f32.xlu0 %v3066_v2  ;;  %3077 = vlog2.f32 %v1646_v53  ;;  %v1896_v2 = vmul.bf16 %v4178_v52, %v3611_v14  ;;  %v1900_v14 = vmul.bf16 %v4178_v52, %v3642_v54 }
 0x6d5   :  { %v3070_v5 = vpop.eup %3069  ;;  %v1650_v59 = vmul.f32 0.6931472, %v3068_v31  ;;  %2761 = vmatpush3.bf16.msra.mxu1 %v1565_v43  ;;  %3079 = vlog2.f32 %v1808_v15  ;;  %v1897_v31 = vmul.bf16 %v4178_v52, %v3607_v12  ;;  %v1901_v12 = vmul.bf16 %v4178_v52, %v3636_v49 }
 0x6d6   :  { %v3072_v24 = vpop.eup %3071  ;;  %2762 = vmatprep.subr.bf16.mxu1 %v1566_v22  ;;  %1979 = vadd.xlane.f32.xlu1 %v3070_v5 }
 0x6d7   :  { %v1652_v62 = vmul.f32 0.6931472, %v3072_v24  ;;  %v1657_v3 = vsub.f32 %v4027_v55, %v1650_v59 }
 0x6d9   :  { %v1658_v13 = vsub.f32 %v4030_v48, %v1652_v62  ;;  %2763 = vmatpush3.bf16.msra.mxu1 %v1566_v22  ;;  %v3074_v55 = vpop.eup %3073  ;;  %v1898_v22 = vmul.bf16 %v4178_v52, %v3625_v28 }
 0x6da   :  { %2764 = vmatprep.subr.bf16.mxu1 %v1567_v61  ;;  %v1656_v45 = vmul.f32 0.6931472, %v3074_v55 }
 0x6db   :  { %v1661_v56 = vpack.c.bf16 %v1658_v13, %v1657_v3 }
 0x6dc   :  { %v1660_v42 = vsub.f32 %v4038_v37, %v1656_v45  ;;  %v1732_v37 = vmul.bf16 %v4177_v44, %v3625_v28  ;;  %v1902_v28 = vmul.bf16 %v4178_v52, %v3656_v9 }
 0x6dd   :  { %2765 = vmatpush3.bf16.msra.mxu1 %v1567_v61  ;;  %2774 = vmatprep.mubr.bf16.mxu1 %v1661_v56  ;;  %v3076_v48 = vpop.eup %3075 }
 0x6de   :  { %2766 = vmatprep.subr.bf16.mxu1 %v1568_v30  ;;  %v3078_v29 = vpop.eup %3077  ;;  %v1818_v51 = vmul.f32 0.6931472, %v3076_v48 }
 0x6df   :  { %v3080_v16 = vpop.eup %3079  ;;  %v1654_v39 = vmul.f32 0.6931472, %v3078_v29  ;;  %v2959_v29 = vld [vmem:[#allocation13 + $0x10] sm:$0xff]  }
 0x6e0   :  { %v1816_v63 = vmul.f32 0.6931472, %v3080_v16  ;;  %v1824_v34 = vsub.f32 %v4046_v20, %v1818_v51  ;;  %v1812_v20 = vpop.xlane.xlu0 %1811  ;;  %v2962_v16 = vld [vmem:[#allocation13 + $0x28] sm:$0xff]  }
 0x6e1   :  { %2767 = vmatpush3.bf16.msra.mxu1 %v1568_v30  ;;  %v1659_v50 = vsub.f32 %v4034_v57, %v1654_v39  ;;  %v1814_v57 = vpop.xlane.xlu1 %1813 }
 0x6e2   :  { %2768 = vmatprep.subr.bf16.mxu1 %v1569_v19  ;;  %v1823_v18 = vsub.f32 %v4042_v4, %v1816_v63  ;;  %v1733_v4 = vmul.bf16 %v4177_v44, %v3619_v26  ;;  %3081 = vlog2.f32 %v1814_v57 }
 0x6e3   :  { %v1662_v10 = vpack.c.bf16 %v1660_v42, %v1659_v50  ;;  %3083 = vlog2.f32 %v1812_v20 }
 0x6e4   :  { %v1827_v47 = vpack.c.bf16 %v1824_v34, %v1823_v18  ;;  %v2245_v34 = vld [vmem:[%s4166_s10] ss:$0 sm:$0xff] }
 0x6e5   :  { %2769 = vmatpush3.bf16.msra.mxu1 %v1569_v19 }
 0x6e6   :  { %2770 = vmatprep.subr.bf16.mxu1 %v1570_v41 }
 0x6e9   :  { %2771 = vmatpush3.bf16.msra.mxu1 %v1570_v41  ;;  %v2958_v41 = vld [vmem:[#allocation13 + $0x8] sm:$0xff]  }
 0x6ea   :  { %2772 = vmatprep.subr.bf16.mxu1 %v1571_v6 }
 0x6ec   :  { %v3082_v36 = vpop.eup %3081 }
 0x6ed   :  { %2773 = vmatpush3.bf16.msra.mxu1 %v1571_v6  ;;  %v3084_v46 = vpop.eup %3083  ;;  %v1822_v25 = vmul.f32 0.6931472, %v3082_v36 }
 0x6ee   :  { %2798 = vmatprep.subr.bf16.mxu1 %v1730_v0  ;;  %v1820_v11 = vmul.f32 0.6931472, %v3084_v46 }
 0x6ef   :  { %v1826_v43 = vsub.f32 %v4056_v33, %v1822_v25  ;;  %v2957_v33 = vld [vmem:[#allocation13] sm:$0xff]  }
 0x6f0   :  { %2775 = vmatmul.mubr.bf16.vlgmr.msra.gmra.mrb[20].mxu1 %v1662_v10  ;;  %v1825_v17 = vsub.f32 %v4051_v32, %v1820_v11  ;;  %v1899_v32 = vmul.bf16 %v4178_v52, %v3619_v26  ;;  %v1903_v26 = vmul.bf16 %v4178_v52, %v3654_v8 }
 0x6f1   :  { %2799 = vmatpush3.bf16.msra.mxu1 %v1730_v0  ;;  %2814 = vmatprep.mubr.bf16.mxu1 %v1827_v47 }
 0x6f2   :  { %2800 = vmatprep.subr.bf16.mxu1 %v1731_v27  ;;  %v1828_v53 = vpack.c.bf16 %v1826_v43, %v1825_v17 }
 0x6f5   :  { %2801 = vmatpush3.bf16.msra.mxu1 %v1731_v27 }
 0x6f6   :  { %2802 = vmatprep.subr.bf16.mxu1 %v1732_v37 }
 0x6f9   :  { %2803 = vmatpush3.bf16.msra.mxu1 %v1732_v37 }
 0x6fa   :  { %2804 = vmatprep.subr.bf16.mxu1 %v1733_v4 }
 0x6fd   :  { %2805 = vmatpush3.bf16.msra.mxu1 %v1733_v4 }
 0x6fe   :  { %2806 = vmatprep.subr.bf16.mxu1 %v1734_v38 }
 0x701   :  { %2807 = vmatpush3.bf16.msra.mxu1 %v1734_v38 }
 0x702   :  { %2808 = vmatprep.subr.bf16.mxu1 %v1735_v7 }
 0x705   :  { %2809 = vmatpush3.bf16.msra.mxu1 %v1735_v7 }
 0x706   :  { %2810 = vmatprep.subr.bf16.mxu1 %v1736_v21 }
 0x709   :  { %2811 = vmatpush3.bf16.msra.mxu1 %v1736_v21 }
 0x70a   :  { %2812 = vmatprep.subr.bf16.mxu1 %v1737_v23 }
 0x70d   :  { %2813 = vmatpush3.bf16.msra.mxu1 %v1737_v23 }
 0x70e   :  { %2838 = vmatprep.subr.bf16.mxu1 %v1896_v2 }
 0x710   :  { %2815 = vmatmul.mubr.bf16.vlgmr.msra.gmra.mrb[20].mxu1 %v1828_v53 }
 0x711   :  { %2839 = vmatpush3.bf16.msra.mxu1 %v1896_v2 }
 0x712   :  { %2840 = vmatprep.subr.bf16.mxu1 %v1897_v31 }
 0x715   :  { %2841 = vmatpush3.bf16.msra.mxu1 %v1897_v31 }
 0x716   :  { %2842 = vmatprep.subr.bf16.mxu1 %v1898_v22 }
 0x719   :  { %2843 = vmatpush3.bf16.msra.mxu1 %v1898_v22 }
 0x71a   :  { %2844 = vmatprep.subr.bf16.mxu1 %v1899_v32 }
 0x71d   :  { %2845 = vmatpush3.bf16.msra.mxu1 %v1899_v32 }
 0x71e   :  { %2846 = vmatprep.subr.bf16.mxu1 %v1900_v14 }
 0x721   :  { %2847 = vmatpush3.bf16.msra.mxu1 %v1900_v14 }
 0x722   :  { %2848 = vmatprep.subr.bf16.mxu1 %v1901_v12 }
 0x725   :  { %2849 = vmatpush3.bf16.msra.mxu1 %v1901_v12 }
 0x726   :  { %2850 = vmatprep.subr.bf16.mxu1 %v1902_v28 }
 0x729   :  { %2851 = vmatpush3.bf16.msra.mxu1 %v1902_v28 }
 0x72a   :  { %2852 = vmatprep.subr.bf16.mxu1 %v1903_v26 }
 0x72d   :  { %2853 = vmatpush3.bf16.msra.mxu1 %v1903_v26 }
 0x72e   :  { %2858 = vmatprep.subr.bf16.mxu1 %v2957_v33 }
 0x75d   :  { %v1974_v54 = vpop.xlane.xlu0 %1973 }
 0x75e   :  { %3085 = vlog2.f32 %v1974_v54 }
 0x75f   :  { %v1976_v5 = vpop.xlane.xlu1 %1975 }
 0x760   :  { %3087 = vlog2.f32 %v1976_v5 }
 0x761   :  { %v1978_v49 = vpop.xlane.xlu0 %1977 }
 0x762   :  { %3089 = vlog2.f32 %v1978_v49 }
 0x763   :  { %v1980_v59 = vpop.xlane.xlu1 %1979 }
 0x764   :  { %3091 = vlog2.f32 %v1980_v59 }
 0x768   :  { %v3086_v24 = vpop.eup %3085 }
 0x769   :  { %v1982_v9 = vmul.f32 0.6931472, %v3086_v24 }
 0x76a   :  { %v3088_v62 = vpop.eup %3087 }
 0x76b   :  { %v1984_v1 = vmul.f32 0.6931472, %v3088_v62  ;;  %v1989_v8 = vsub.f32 %v4063_v40, %v1982_v9  ;;  %v2960_v40 = vld [vmem:[#allocation13 + $0x18] sm:$0xff]  }
 0x76c   :  { %v3090_v61 = vpop.eup %3089 }
 0x76d   :  { %v1990_v3 = vsub.f32 %v4067_v35, %v1984_v1  ;;  %v1986_v13 = vmul.f32 0.6931472, %v3090_v61  ;;  %v2961_v35 = vld [vmem:[#allocation13 + $0x20] sm:$0xff]  }
 0x76e   :  { %v3092_v15 = vpop.eup %3091 }
 0x76f   :  { %v1988_v56 = vmul.f32 0.6931472, %v3092_v15  ;;  %v1993_v30 = vpack.c.bf16 %v1990_v3, %v1989_v8  ;;  %v1991_v19 = vsub.f32 %v4071_v58, %v1986_v13  ;;  %v2963_v58 = vld [vmem:[#allocation13 + $0x30] sm:$0xff]  }
 0x771   :  { %v1992_v55 = vsub.f32 %v4075_v60, %v1988_v56  ;;  %2854 = vmatprep.mubr.bf16.mxu1 %v1993_v30  ;;  %v2964_v60 = vld [vmem:[#allocation13 + $0x38] sm:$0xff]  }
 0x773   :  { %v1994_v48 = vpack.c.bf16 %v1992_v55, %v1991_v19 }
 0x775   :  { %2855 = vmatmul.mubr.bf16.vlgmr.msra.gmra.mrb[20].mxu1 %v1994_v48 }
 0x776   :  { %2859 = vmatpush3.bf16.msra.mxu1 %v2957_v33 }
 0x777   :  { %2860 = vmatprep.subr.bf16.mxu1 %v2958_v41 }
 0x77a   :  { %2861 = vmatpush3.bf16.msra.mxu1 %v2958_v41 }
 0x77b   :  { %2862 = vmatprep.subr.bf16.mxu1 %v2959_v29 }
 0x77e   :  { %2863 = vmatpush3.bf16.msra.mxu1 %v2959_v29 }
 0x77f   :  { %2864 = vmatprep.subr.bf16.mxu1 %v2960_v40 }
 0x782   :  { %2865 = vmatpush3.bf16.msra.mxu1 %v2960_v40 }
 0x783   :  { %2866 = vmatprep.subr.bf16.mxu1 %v2961_v35 }
 0x786   :  { %2867 = vmatpush3.bf16.msra.mxu1 %v2961_v35 }
 0x787   :  { %2868 = vmatprep.subr.bf16.mxu1 %v2962_v16 }
 0x78a   :  { %2869 = vmatpush3.bf16.msra.mxu1 %v2962_v16 }
 0x78b   :  { %2870 = vmatprep.subr.bf16.mxu1 %v2963_v58 }
 0x78e   :  { %2871 = vmatpush3.bf16.msra.mxu1 %v2963_v58 }
 0x78f   :  { %2872 = vmatprep.subr.bf16.mxu1 %v2964_v60 }
 0x792   :  { %2873 = vmatpush3.bf16.msra.mxu1 %v2964_v60 }
 0x848   :  { %v2856_v45 = vpop.f32.mrb[20].mxu1 }
 0x849   :  { %v2029_v51 = vpop.f32.mrb[21].mxu1 }
 0x84a   :  { %v2857_v39 = vpop.f32.mrb[22].mxu1 }
 0x84b   :  { %v2049_v6 = vpack.c.bf16 %v2857_v39, %v2856_v45  ;;  %v2032_v63 = vpop.f32.mrb[23].mxu1 }
 0x84c   :  { %v2048_v42 = vpack.c.bf16 %v2032_v63, %v2029_v51 }
 0x84e   :  { %2874 = vmatprep.mubr.bf16.mxu1 %v2048_v42 }
 0x84f   :  { %2875 = vmatmul.mubr.bf16.vlgmr.msra.gmra.mrb[28].mxu1 %v2049_v6 }
 0x922   :  { %v2876_v50 = vpop.f32.mrb[28].mxu1 }
 0x923   :  { %v2164_v44 = vadd.f32 %v2876_v50, %v2245_v34  ;;  %v2155_v0 = vpop.f32.mrb[29].mxu1 }
 0x924   :  { %v2156_v18 = vadd.f32 %v2245_v34, %v2155_v0  ;;  %v2877_v10 = vpop.f32.mrb[30].mxu1 }
 0x925   :  { %2172 = vst [vmem:[#allocation14 + $0x10] sm:$0xff] %v2164_v44  ;;  %v2167_v47 = vadd.f32 %v2877_v10, %v2245_v34  ;;  %v2158_v27 = vpop.f32.mrb[31].mxu1 }
 0x926   :  { %2170 = vst [vmem:[#allocation14] sm:$0xff] %v2156_v18  ;;  %v2159_v37 = vadd.f32 %v2245_v34, %v2158_v27 }
 0x927   :  { %2173 = vst [vmem:[#allocation14 + $0x18] sm:$0xff] %v2167_v47 }
 0x928   :  { %2171 = vst [vmem:[#allocation14 + $0x8] sm:$0xff] %v2159_v37 }
 0x929   :  { %3258 = shalt.err (!%p3255_p4)
}
 0x92a   :  { %s3259_s7 = scalar_lea.hbm %s4167_s11, 512 }
 0x92b   :  { %p3260_p5 = scmp.ne.s32.totalorder %s4167_s11, %s3259_s7  ;;  %p3263_p6 = scmp.lt.u32.totalorder %s3259_s7, %s4167_s11 }
 0x92d   :  { %p3265_p7 = pnand %p3263_p6, %p3260_p5 }
 0x92f   :  { %3268 = shalt.err (!%p3265_p7)
}
 0x930   :  { %s3290_s14 = smov 128   ;;  %s3291_s16 = smov 8  }
 0x931   :  { %2185 = dma.vmem_to_hbm [thread:$0]  %s2180_s24, 512, %s4167_s11, [#allocation4], %s3290_s14, %s3290_s14, %s3291_s16  }
 0x932   :  { %3277 = dma.done.wait [#allocation4], 512  }
 0x933   :  { %3278 = vsyncadd [#allocation4], 4294966784 }
 0x934   :  { %2189 = vsyncpa [#allocation3], 1 }
 0x935   :  { %2190 = vsyncpa [#allocation6], 1 }
 0x936   :  { %2191 = vsyncpa [#allocation9], 1 }
 0x937   :  { %2192 = vsyncpa [#allocation12], 1 }
 0x938   :  { %2193 = vsyncpa [#allocation4], 1 }

</bundles_post_ra>
